<compile_context>
chip_gen: v5e
topology: v5e:2x2
jax: 0.10.0
libtpu: 0.0.40
codegen_flags: <defaults>
</compile_context>

<pallas_src>
import functools
import math

import jax
import jax.numpy as jnp
from jax.experimental import pallas as pl
from jax.experimental.pallas import tpu as pltpu

INV_SQRT2 = 1.0 / math.sqrt(2.0)
INV_SQRT_2PI = 1.0 / math.sqrt(2.0 * math.pi)
HALF_PI = 0.5 * math.pi
HIGHEST = jax.lax.Precision.HIGHEST


# ----------------------------------------------------------------------------
# Pallas kernel: ALL timesteps of one MLP in one invocation (unrolled loop).
# ----------------------------------------------------------------------------
def wavepde_fused_kernel(tsel_ref,                       # SMEM (1,) int32: selected step
                         z_ref, wx_ref, bx_ref, wxsum_ref, wf_ref, wo_ref,
                         bo_ref, c2_ref, tb0_ref, tb1_ref, tb2_ref,
                         uz1_ref, lat1_ref, u_ref, ic_ref, pde_ref):
    B, D = z_ref.shape
    n_steps = tb0_ref.shape[0]          # == half_range + 1
    half_range = n_steps - 1
    t_sel = tsel_ref[0]

    # Hoisted loads: read each weight / bias exactly once for all steps.
    Wx = wx_ref[...]                    # (D, D) layer_x weight
    bx = bx_ref[...]                    # (1, D)
    wxsum = wxsum_ref[...]              # (1, D) ones @ Wx.T (host-precomputed)
    Wf = wf_ref[...]                    # (D, D) layer_fusion weight
    wo = wo_ref[...]                    # (1, D) layer_out weight
    bo = bo_ref[...]                    # (1, 1)
    c2 = c2_ref[...]                    # (1, 1) wave speed squared

    def matT(x, w):                     # x @ w.T (torch Linear layout)
        return jax.lax.dot_general(x, w, (((1,), (1,)), ((), ())),
                                   preferred_element_type=jnp.float32)

    def mat(x, w):                      # x @ w
        return jnp.dot(x, w, preferred_element_type=jnp.float32)

    def wo_dot(x):                      # D -> 1 output layer on the VPU
        return jnp.sum(x * wo, axis=-1, keepdims=True)

    z = z_ref[...]                                        # carried latent (B, D)
    pde_acc = jnp.zeros((1, 1), jnp.float32)

    for i in range(n_steps):
        last = (i == half_range)        # extra step: only its u_z is ever used
        tb0 = tb0_ref[i:i + 1, :]       # time contribution to a3 (+ fused bias)

        # ---- z branch (+ forward dual along ones(D) for Hessian @ 1) ----
        a1 = matT(z, Wx) + bx
        x1 = jnp.tanh(a1)
        g1 = 1.0 - x1 * x1

        if not last:
            tb1 = tb1_ref[i:i + 1, :]   # d a3 / dt      (step-index-only, hoisted)
            tb2 = tb2_ref[i:i + 1, :]   # d2 a3 / dt2
            x1d = g1 * wxsum
            g1d = -2.0 * x1 * x1d
            AX = matT(jnp.concatenate([x1, x1d], axis=0), Wf)    # (2B, D)
            a3 = AX[:B] + tb0
            a3d = AX[B:]
        else:
            a3 = matT(x1, Wf) + tb0

        h3 = jnp.tanh(a3)
        g3 = 1.0 - h3 * h3
        a4 = wo_dot(h3) + bo
        u = jnp.tanh(a4)                                  # (B, 1)
        c4 = 1.0 - u * u
        g3wo = g3 * wo
        ga3 = c4 * g3wo                                   # d u / d a3

        if not last:
            # time derivatives (for u_tt) and dual chain (for H @ ones)
            h3d = g3 * a3d
            g3d = -2.0 * h3 * h3d
            h3t1 = g3 * tb1
            h3t2 = -2.0 * h3 * h3t1 * tb1 + g3 * tb2
            a4d = wo_dot(h3d)
            a4t1 = wo_dot(h3t1)
            a4t2 = wo_dot(h3t2)
            ud = c4 * a4d
            c4d = -2.0 * u * ud
            ut1 = c4 * a4t1
            ut2 = -2.0 * u * ut1 * a4t1 + c4 * a4t2       # per-sample d2u/dt2

            ga3d = c4d * g3wo + c4 * (g3d * wo)
            GS = mat(jnp.concatenate([ga3, ga3d], axis=0), Wf)   # (2B, D)
            ga1 = GS[:B] * g1
            ga1d = GS[B:] * g1 + GS[:B] * g1d
            UZ = mat(jnp.concatenate([ga1, ga1d], axis=0), Wx)   # (2B, D)
            uz = UZ[:B]                                   # u_z
            uzz = UZ[B:]                                  # H @ ones
            z_new = z + uz

            # In-kernel PDE residual reduction (nothing per-step goes to HBM).
            utt_sum = jnp.sum(ut2, axis=0, keepdims=True)         # (1, 1)
            pde = utt_sum - c2 * uzz                              # (B, D)
            pde_acc = pde_acc + jnp.sum(pde * pde, keepdims=True)
        else:
            ga1 = mat(ga3, Wf) * g1
            uz = mat(ga1, Wx)

        # loss_ic: u_z at (original z, t = 0) == step-0 u_z of this loop.
        if i == 0:
            ic_ref[...] = jnp.mean(uz * uz, keepdims=True)

        if not last:
            @pl.when(t_sel == i)
            def _():
                lat1_ref[...] = z_new                     # latent1 = z + u_z
                u_ref[...] = u                            # energy
            z = z_new

        if i >= 1:
            @pl.when(t_sel == i - 1)
            def _():
                uz1_ref[...] = uz                         # u_z(z + u_z, t_sel + 1)

    # sum over steps of mean((u_tt - c^2 u_zz)^2)
    pde_ref[...] = pde_acc * (1.0 / float(B * D))


# ----------------------------------------------------------------------------
# Step-index-only time branch, precomputed for all steps in plain JAX.
# ----------------------------------------------------------------------------
def _time_branch_tables(kp, n_steps):
    """Returns (tb0, tb1, tb2), each (n_steps, D):
       tb0 = time contribution to a3 (through layer_time2->layer_fusion) + fused bias,
       tb1 = d tb0 / dt, tb2 = d2 tb0 / dt2 (biases drop out of derivatives)."""
    D = kp["Wx"].shape[0]
    half = D // 2
    ts = jnp.arange(n_steps, dtype=jnp.float32)                         # (S,)
    fr = kp["fr"].reshape(-1)                                           # (D,)
    r = jnp.arange(3, dtype=jnp.float32)                                # (3,)
    # r-th time derivative of sin/cos(t*f) == f^r * trig(t*f + r*pi/2)
    arg = ts[:, None, None] * fr[None, None, :] + r[None, :, None] * HALF_PI
    is_sin = (jnp.arange(D) < half)[None, None, :]
    trig = jnp.where(is_sin, jnp.sin(arg), jnp.cos(arg))
    frpow = fr[None, None, :] ** r[None, :, None]                       # (1, 3, D)
    E = frpow * trig                                                    # (S, 3, D)
    P = jnp.einsum("srd,ed->sre", E, kp["Wt"], precision=HIGHEST)       # layer_time
    p = P[:, 0, :] + kp["bt"]
    p1 = P[:, 1, :]
    p2 = P[:, 2, :]
    # exact GELU (erf form, torch default): value / 1st / 2nd derivative
    Phi = 0.5 * (1.0 + jax.lax.erf(p * INV_SQRT2))
    phi = jnp.exp(-0.5 * p * p) * INV_SQRT_2PI
    gp1 = Phi + p * phi
    gp2 = (2.0 - p * p) * phi
    Q = jnp.stack([p * Phi, gp1 * p1, gp2 * p1 * p1 + gp1 * p2], axis=1)  # (S,3,D)
    # layer_time2 -> layer_fusion folded into one matrix (Wcomb = Wf @ Wt2)
    T3 = jnp.einsum("srd,ed->sre", Q, kp["Wcomb"], precision=HIGHEST)
    tb0 = T3[:, 0, :] + kp["bff"]                                       # bias folded in
    return tb0, T3[:, 1, :], T3[:, 2, :]


# ----------------------------------------------------------------------------
# Wrapper: one pallas_call (grid=(1,)) runs the whole forward recurrence.
# ----------------------------------------------------------------------------
@functools.partial(jax.jit, static_argnames=("half_range",))
def wavepde_forward_core(kp, z, tsel, c2, *, half_range):
    B, D = z.shape
    n_steps = half_range + 1
    f32 = jnp.float32
    tb0, tb1, tb2 = _time_branch_tables(kp, n_steps)

    full = lambda i, *_: (0, 0)                 # everything VMEM-resident, DMA'd once
    in_specs = [
        pl.BlockSpec((B, D), full),             # z
        pl.BlockSpec((D, D), full),             # Wx
        pl.BlockSpec((1, D), full),             # bx
        pl.BlockSpec((1, D), full),             # ones @ Wx.T
        pl.BlockSpec((D, D), full),             # Wf
        pl.BlockSpec((1, D), full),             # Wo
        pl.BlockSpec((1, 1), full),             # bo
        pl.BlockSpec((1, 1), full),             # c^2
        pl.BlockSpec((n_steps, D), full),       # tb0
        pl.BlockSpec((n_steps, D), full),       # tb1
        pl.BlockSpec((n_steps, D), full),       # tb2
    ]
    out_specs = [
        pl.BlockSpec((B, D), full),             # u_z1 (at step t_sel + 1)
        pl.BlockSpec((B, D), full),             # latent1 (z + u_z at step t_sel)
        pl.BlockSpec((B, 1), full),             # energy u (at step t_sel)
        pl.BlockSpec((1, 1), full),             # mse_ic
        pl.BlockSpec((1, 1), full),             # mse_pde (sum of per-step means)
    ]
    grid_spec = pltpu.PrefetchScalarGridSpec(
        num_scalar_prefetch=1,
        grid=(1,),
        in_specs=in_specs,
        out_specs=out_specs,
    )

    flops = int(half_range * (14 * B * D * D + 60 * B * D) + 8 * B * D * D)
    transcendentals = int(n_steps * (2 * B * D + B))
    bytes_accessed = int(4 * (3 * B * D + 2 * D * D + (3 * n_steps + 5) * D + B + 4))

    uz1, lat1, u_sel, ic, pde = pl.pallas_call(
        wavepde_fused_kernel,
        out_shape=(jax.ShapeDtypeStruct((B, D), f32),
                   jax.ShapeDtypeStruct((B, D), f32),
                   jax.ShapeDtypeStruct((B, 1), f32),
                   jax.ShapeDtypeStruct((1, 1), f32),
                   jax.ShapeDtypeStruct((1, 1), f32)),
        grid_spec=grid_spec,
        compiler_params=pltpu.CompilerParams(
            dimension_semantics=("arbitrary",)),
        cost_estimate=pl.CostEstimate(flops=flops,
                                      transcendentals=transcendentals,
                                      bytes_accessed=bytes_accessed),
    )(tsel, z, kp["Wx"], kp["bx"], kp["wx_rowsum"], kp["Wf"], kp["Wo"],
      kp["bo"], c2, tb0, tb1, tb2)

    return uz1, lat1, u_sel, ic[0, 0], pde[0, 0]


# ----------------------------------------------------------------------------
# Parameters (PyTorch nn.Linear default init) + kernel-side preprocessing.
# ----------------------------------------------------------------------------
def _init_linear(key, n_out, n_in):
    kw, kb = jax.random.split(key)
    bound = 1.0 / math.sqrt(n_in)
    w = jax.random.uniform(kw, (n_out, n_in), jnp.float32, -bound, bound)
    b = jax.random.uniform(kb, (n_out,), jnp.float32, -bound, bound)
    return w, b


def init_mlp_raw(key, D):
    assert D % 2 == 0 and D >= 4, "support_vectors_dim must be even and >= 4"
    ks = jax.random.split(key, 5)
    Wx, bx = _init_linear(ks[0], D, D)       # layer_x
    Wt, bt = _init_linear(ks[1], D, D)       # layer_time
    Wt2, bt2 = _init_linear(ks[2], D, D)     # layer_time2
    Wf, bf = _init_linear(ks[3], D, D)       # layer_fusion
    Wo, bo = _init_linear(ks[4], 1, D)       # layer_out
    half = D // 2
    emb_scale = math.log(10000.0) / (half - 1)
    freq = jnp.exp(jnp.arange(half, dtype=jnp.float32) * (-emb_scale))
    return dict(Wx=Wx, bx=bx, Wt=Wt, bt=bt, Wt2=Wt2, bt2=bt2,
                Wf=Wf, bf=bf, Wo=Wo, bo=bo, freq=freq)


def prep_kernel_params(raw):
    D = raw["Wx"].shape[0]
    Wf = raw["Wf"]
    return dict(
        Wx=raw["Wx"],
        bx=raw["bx"].reshape(1, D),
        wx_rowsum=jnp.sum(raw["Wx"], axis=1).reshape(1, D),    # ones @ Wx.T
        Wt=raw["Wt"],
        bt=raw["bt"].reshape(1, D),
        Wcomb=jnp.dot(Wf, raw["Wt2"], precision=HIGHEST),      # fold time2->fusion
        Wf=Wf,
        bff=(raw["bf"] + jnp.dot(raw["bt2"], Wf.T, precision=HIGHEST)).reshape(1, D),
        Wo=raw["Wo"].reshape(1, D),
        bo=raw["bo"].reshape(1, 1),
        fr=jnp.concatenate([raw["freq"], raw["freq"]]).reshape(1, D),
    )


# ----------------------------------------------------------------------------
# WavePDE module (forward semantics of the PyTorch reference).
# ----------------------------------------------------------------------------
class WavePDEPallas:
    def __init__(self, num_support_sets, num_support_timesteps,
                 support_vectors_dim, key):
        self.num_support_sets = num_support_sets
        self.num_support_timesteps = num_support_timesteps
        self.support_vectors_dim = support_vectors_dim
        self.c = jnp.ones((num_support_sets, 1), jnp.float32)
        keys = jax.random.split(key, num_support_sets)
        self.raw = [init_mlp_raw(k, support_vectors_dim) for k in keys]
        self.kparams = [prep_kernel_params(r) for r in self.raw]

    def forward(self, index, z, t, generator):
        kp = self.kparams[index]
        half_range = self.num_support_timesteps // 2
        t_sel = int(t[0])
        B = z.shape[0]
        tsel = jnp.array([t_sel], dtype=jnp.int32)
        c2 = jnp.square(self.c[index]).reshape(1, 1)

        uz1, latent1, u_sel, mse_ic, mse_pde = wavepde_forward_core(
            kp, z, tsel, c2, half_range=half_range)

        energy = u_sel.reshape(1, B, 1)        # torch broadcast yields (1, B, 1)
        latent2 = latent1 + uz1
        # loss_jvp with the external generator stays in plain JAX.
        _, jvp_value = jax.jvp(generator, (latent1,), (uz1,))
        mse_jvp = jnp.mean(jnp.square(jvp_value))

        loss = mse_ic + mse_pde / half_range - mse_jvp
        return energy, latent1, latent2, loss


# ----------------------------------------------------------------------------
# Pure-JAX autodiff reference (mirrors the PyTorch module) for validation.
# ----------------------------------------------------------------------------
def _lin(x, W, b):
    return jnp.dot(x, W.T, precision=HIGHEST) + b


def mlp_reference(raw, z, tval):
    emb = tval * raw["freq"]
    e = jnp.concatenate([jnp.sin(emb), jnp.cos(emb)])
    x1 = jnp.tanh(_lin(z, raw["Wx"], raw["bx"]))
    p = _lin(e, raw["Wt"], raw["bt"])
    q = jax.nn.gelu(p, approximate=False)
    te = _lin(q, raw["Wt2"], raw["bt2"])
    h = jnp.tanh(_lin(x1 + te, raw["Wf"], raw["bf"]))
    return jnp.tanh(_lin(h, raw["Wo"], raw["bo"]))       # (B, 1)


def forward_reference(raw, c, z, t_sel, half_range, generator):
    c = c.reshape(())

    def usum(zz, tv):
        return jnp.sum(mlp_reference(raw, zz, tv))

    uz_fn = jax.grad(usum, argnums=0)
    ut_fn = jax.grad(usum, argnums=1)
    utt_fn = jax.grad(ut_fn, argnums=1)
    uzz_fn = jax.grad(lambda zz, tv: jnp.sum(uz_fn(zz, tv)), argnums=0)

    mse_ic = jnp.mean(jnp.square(uz_fn(z, jnp.asarray(0.0, jnp.float32))))
    mse_pde = 0.0
    energy = latent1 = latent2 = mse_jvp = None
    for i in range(half_range):
        ti = jnp.asarray(float(i), jnp.float32)
        u = mlp_reference(raw, z, ti)
        u_z = uz_fn(z, ti)
        u_tt = utt_fn(z, ti)
        u_zz = uzz_fn(z, ti)
        mse_pde = mse_pde + jnp.mean(jnp.square(u_tt - c ** 2 * u_zz))
        if i == t_sel:
            z2 = z + u_z
            u_z1 = uz_fn(z2, ti + 1.0)
            _, jvpv = jax.jvp(generator, (z2,), (u_z1,))
            mse_jvp = jnp.mean(jnp.square(jvpv))
            energy = u.reshape(1, u.shape[0], 1)
            latent1 = z2
            latent2 = z2 + u_z1
        z = z + u_z
    loss = mse_ic + mse_pde / half_range - mse_jvp
    return energy, latent1, latent2, loss


if __name__ == "__main__":
    key = jax.random.PRNGKey(0)
    k_params, k_z, k_gen = jax.random.split(key, 3)

    num_support_sets = 2
    num_support_timesteps = 8            # half_range = 4
    support_vectors_dim = 32
    batch = 8                            # multiple of 8 keeps sublane tiles aligned

    model = WavePDEPallas(num_support_sets, num_support_timesteps,
                          support_vectors_dim, k_params)

    z = jax.random.normal(k_z, (batch, support_vectors_dim), jnp.float32)
    t = jnp.array([1.0], jnp.float32)    # int(t[0]) == 1 < half_range

    # Deterministic stand-in for the external `generator` argument.
    G = 0.1 * jax.random.normal(k_gen, (support_vectors_dim,
                                        support_vectors_dim), jnp.float32)
    generator = lambda zz: jnp.tanh(zz @ G)

    energy, latent1, latent2, loss = model.forward(0, z, t, generator)
    jax.block_until_ready((energy, latent1, latent2, loss))

    assert energy.shape == (1, batch, 1)
    assert latent1.shape == (batch, support_vectors_dim)
    assert latent2.shape == (batch, support_vectors_dim)
    assert loss.shape == ()

    # Validate against the pure-JAX autodiff reference of the PyTorch module.
    e_ref, l1_ref, l2_ref, loss_ref = forward_reference(
        model.raw[0], model.c[0], z, int(t[0]),
        num_support_timesteps // 2, generator)

    def _check(name, a, b, atol=1e-4, rtol=1e-2):
        a = jnp.asarray(a, jnp.float32)
        b = jnp.asarray(b, jnp.float32)
        if not bool(jnp.allclose(a, b, atol=atol, rtol=rtol)):
            raise AssertionError(
                f"{name} mismatch: max abs err {float(jnp.max(jnp.abs(a - b)))}")

    _check("energy", energy, e_ref)
    _check("latent1", latent1, l1_ref)
    _check("latent2", latent2, l2_ref)
    _check("loss", loss, loss_ref)

    print("KERNEL_OK")
</pallas_src>

<mosaic_0001>
module attributes {stable_mosaic.version = 11 : i64} {
  func.func @wavepde_fused_kernel(%arg0: i32, %arg1: memref<1xi32, #tpu.memory_space<smem>>, %arg2: memref<8x32xf32, #tpu.memory_space<vmem>>, %arg3: memref<32x32xf32, #tpu.memory_space<vmem>>, %arg4: memref<1x32xf32, #tpu.memory_space<vmem>>, %arg5: memref<1x32xf32, #tpu.memory_space<vmem>>, %arg6: memref<32x32xf32, #tpu.memory_space<vmem>>, %arg7: memref<1x32xf32, #tpu.memory_space<vmem>>, %arg8: memref<1x1xf32, #tpu.memory_space<vmem>>, %arg9: memref<1x1xf32, #tpu.memory_space<vmem>>, %arg10: memref<5x32xf32, #tpu.memory_space<vmem>>, %arg11: memref<5x32xf32, #tpu.memory_space<vmem>>, %arg12: memref<5x32xf32, #tpu.memory_space<vmem>>, %arg13: memref<8x32xf32, #tpu.memory_space<vmem>>, %arg14: memref<8x32xf32, #tpu.memory_space<vmem>>, %arg15: memref<8x1xf32, #tpu.memory_space<vmem>>, %arg16: memref<1x1xf32, #tpu.memory_space<vmem>>, %arg17: memref<1x1xf32, #tpu.memory_space<vmem>>) attributes {dimension_semantics = [#tpu.dimension_semantics<arbitrary>], iteration_bounds = array<i64: 1>, scalar_prefetch = 1 : i64, scratch_operands = 0 : i64, tpu.core_type = #tpu.core_type<tc>, window_params = [{pipeline_mode = #tpu.pipeline_mode<synchronous>, transform_indices = @transform_0, window_bounds = array<i64: 8, 32>}, {pipeline_mode = #tpu.pipeline_mode<synchronous>, transform_indices = @transform_1, window_bounds = array<i64: 32, 32>}, {pipeline_mode = #tpu.pipeline_mode<synchronous>, transform_indices = @transform_2, window_bounds = array<i64: 1, 32>}, {pipeline_mode = #tpu.pipeline_mode<synchronous>, transform_indices = @transform_3, window_bounds = array<i64: 1, 32>}, {pipeline_mode = #tpu.pipeline_mode<synchronous>, transform_indices = @transform_4, window_bounds = array<i64: 32, 32>}, {pipeline_mode = #tpu.pipeline_mode<synchronous>, transform_indices = @transform_5, window_bounds = array<i64: 1, 32>}, {pipeline_mode = #tpu.pipeline_mode<synchronous>, transform_indices = @transform_6, window_bounds = array<i64: 1, 1>}, {pipeline_mode = #tpu.pipeline_mode<synchronous>, transform_indices = @transform_7, window_bounds = array<i64: 1, 1>}, {pipeline_mode = #tpu.pipeline_mode<synchronous>, transform_indices = @transform_8, window_bounds = array<i64: 5, 32>}, {pipeline_mode = #tpu.pipeline_mode<synchronous>, transform_indices = @transform_9, window_bounds = array<i64: 5, 32>}, {pipeline_mode = #tpu.pipeline_mode<synchronous>, transform_indices = @transform_10, window_bounds = array<i64: 5, 32>}, {pipeline_mode = #tpu.pipeline_mode<synchronous>, transform_indices = @transform_11, window_bounds = array<i64: 8, 32>}, {pipeline_mode = #tpu.pipeline_mode<synchronous>, transform_indices = @transform_12, window_bounds = array<i64: 8, 32>}, {pipeline_mode = #tpu.pipeline_mode<synchronous>, transform_indices = @transform_13, window_bounds = array<i64: 8, 1>}, {pipeline_mode = #tpu.pipeline_mode<synchronous>, transform_indices = @transform_14, window_bounds = array<i64: 1, 1>}, {pipeline_mode = #tpu.pipeline_mode<synchronous>, transform_indices = @transform_15, window_bounds = array<i64: 1, 1>}]} {
    %c0 = arith.constant 0 : index
    %0 = memref.load %arg1[%c0] : memref<1xi32, #tpu.memory_space<smem>>
    %c0_0 = arith.constant 0 : index
    %c0_1 = arith.constant 0 : index
    %1 = vector.load %arg3[%c0_0, %c0_1] : memref<32x32xf32, #tpu.memory_space<vmem>>, vector<32x32xf32>
    %c0_2 = arith.constant 0 : index
    %c0_3 = arith.constant 0 : index
    %2 = vector.load %arg4[%c0_2, %c0_3] : memref<1x32xf32, #tpu.memory_space<vmem>>, vector<1x32xf32>
    %c0_4 = arith.constant 0 : index
    %c0_5 = arith.constant 0 : index
    %3 = vector.load %arg5[%c0_4, %c0_5] : memref<1x32xf32, #tpu.memory_space<vmem>>, vector<1x32xf32>
    %c0_6 = arith.constant 0 : index
    %c0_7 = arith.constant 0 : index
    %4 = vector.load %arg6[%c0_6, %c0_7] : memref<32x32xf32, #tpu.memory_space<vmem>>, vector<32x32xf32>
    %c0_8 = arith.constant 0 : index
    %c0_9 = arith.constant 0 : index
    %5 = vector.load %arg7[%c0_8, %c0_9] : memref<1x32xf32, #tpu.memory_space<vmem>>, vector<1x32xf32>
    %c0_10 = arith.constant 0 : index
    %c0_11 = arith.constant 0 : index
    %6 = vector.load %arg8[%c0_10, %c0_11] : memref<1x1xf32, #tpu.memory_space<vmem>>, vector<1x1xf32>
    %c0_12 = arith.constant 0 : index
    %c0_13 = arith.constant 0 : index
    %7 = vector.load %arg9[%c0_12, %c0_13] : memref<1x1xf32, #tpu.memory_space<vmem>>, vector<1x1xf32>
    %c0_14 = arith.constant 0 : index
    %c0_15 = arith.constant 0 : index
    %8 = vector.load %arg2[%c0_14, %c0_15] : memref<8x32xf32, #tpu.memory_space<vmem>>, vector<8x32xf32>
    %cst = arith.constant 0.000000e+00 : f32
    %9 = vector.broadcast %cst : f32 to vector<1x1xf32>
    %c0_16 = arith.constant 0 : index
    %c0_17 = arith.constant 0 : index
    %10 = vector.load %arg10[%c0_16, %c0_17] : memref<5x32xf32, #tpu.memory_space<vmem>>, vector<1x32xf32>
    %cst_18 = arith.constant dense<0.000000e+00> : vector<8x32xf32>
    %11 = tpu.matmul %8, %1, %cst_18 {dimension_numbers = #tpu.dot_dimension_numbers<[1], [1], [0], [0], [0, 0, 1, 0], [], []>} : vector<8x32xf32>, vector<32x32xf32>, vector<8x32xf32> -> vector<8x32xf32>
    %12 = vector.broadcast %2 : vector<1x32xf32> to vector<8x32xf32>
    %13 = arith.addf %11, %12 : vector<8x32xf32>
    %14 = math.tanh %13 : vector<8x32xf32>
    %15 = arith.mulf %14, %14 : vector<8x32xf32>
    %cst_19 = arith.constant 1.000000e+00 : f32
    %16 = vector.broadcast %cst_19 : f32 to vector<8x32xf32>
    %17 = arith.subf %16, %15 : vector<8x32xf32>
    %c0_20 = arith.constant 0 : index
    %c0_21 = arith.constant 0 : index
    %18 = vector.load %arg11[%c0_20, %c0_21] : memref<5x32xf32, #tpu.memory_space<vmem>>, vector<1x32xf32>
    %c0_22 = arith.constant 0 : index
    %c0_23 = arith.constant 0 : index
    %19 = vector.load %arg12[%c0_22, %c0_23] : memref<5x32xf32, #tpu.memory_space<vmem>>, vector<1x32xf32>
    %20 = vector.broadcast %3 : vector<1x32xf32> to vector<8x32xf32>
    %21 = arith.mulf %17, %20 : vector<8x32xf32>
    %cst_24 = arith.constant -2.000000e+00 : f32
    %22 = vector.broadcast %cst_24 : f32 to vector<8x32xf32>
    %23 = arith.mulf %22, %14 : vector<8x32xf32>
    %24 = arith.mulf %23, %21 : vector<8x32xf32>
    %25 = tpu.concatenate %14, %21 in 0 : vector<8x32xf32>, vector<8x32xf32> -> vector<16x32xf32>
    %cst_25 = arith.constant dense<0.000000e+00> : vector<16x32xf32>
    %26 = tpu.matmul %25, %4, %cst_25 {dimension_numbers = #tpu.dot_dimension_numbers<[1], [1], [0], [0], [0, 0, 1, 0], [], []>} : vector<16x32xf32>, vector<32x32xf32>, vector<16x32xf32> -> vector<16x32xf32>
    %27 = vector.extract_strided_slice %26 {offsets = [0, 0], sizes = [8, 32], strides = [1, 1]} : vector<16x32xf32> to vector<8x32xf32>
    %28 = vector.broadcast %10 : vector<1x32xf32> to vector<8x32xf32>
    %29 = arith.addf %27, %28 : vector<8x32xf32>
    %30 = vector.extract_strided_slice %26 {offsets = [8, 0], sizes = [8, 32], strides = [1, 1]} : vector<16x32xf32> to vector<8x32xf32>
    %31 = math.tanh %29 : vector<8x32xf32>
    %32 = arith.mulf %31, %31 : vector<8x32xf32>
    %cst_26 = arith.constant 1.000000e+00 : f32
    %33 = vector.broadcast %cst_26 : f32 to vector<8x32xf32>
    %34 = arith.subf %33, %32 : vector<8x32xf32>
    %35 = vector.broadcast %5 : vector<1x32xf32> to vector<8x32xf32>
    %36 = arith.mulf %31, %35 : vector<8x32xf32>
    %cst_27 = arith.constant dense<0.000000e+00> : vector<8xf32>
    %37 = vector.multi_reduction <add>, %36, %cst_27 [1] : vector<8x32xf32> to vector<8xf32>
    %38 = vector.shape_cast %37 : vector<8xf32> to vector<8x1xf32>
    %39 = vector.broadcast %6 : vector<1x1xf32> to vector<8x1xf32>
    %40 = arith.addf %38, %39 : vector<8x1xf32>
    %41 = math.tanh %40 : vector<8x1xf32>
    %42 = arith.mulf %41, %41 : vector<8x1xf32>
    %cst_28 = arith.constant 1.000000e+00 : f32
    %43 = vector.broadcast %cst_28 : f32 to vector<8x1xf32>
    %44 = arith.subf %43, %42 : vector<8x1xf32>
    %45 = vector.broadcast %5 : vector<1x32xf32> to vector<8x32xf32>
    %46 = arith.mulf %34, %45 : vector<8x32xf32>
    %47 = vector.broadcast %44 : vector<8x1xf32> to vector<8x32xf32>
    %48 = arith.mulf %47, %46 : vector<8x32xf32>
    %49 = arith.mulf %34, %30 : vector<8x32xf32>
    %cst_29 = arith.constant -2.000000e+00 : f32
    %50 = vector.broadcast %cst_29 : f32 to vector<8x32xf32>
    %51 = arith.mulf %50, %31 : vector<8x32xf32>
    %52 = arith.mulf %51, %49 : vector<8x32xf32>
    %53 = vector.broadcast %18 : vector<1x32xf32> to vector<8x32xf32>
    %54 = arith.mulf %34, %53 : vector<8x32xf32>
    %cst_30 = arith.constant -2.000000e+00 : f32
    %55 = vector.broadcast %cst_30 : f32 to vector<8x32xf32>
    %56 = arith.mulf %55, %31 : vector<8x32xf32>
    %57 = arith.mulf %56, %54 : vector<8x32xf32>
    %58 = vector.broadcast %18 : vector<1x32xf32> to vector<8x32xf32>
    %59 = arith.mulf %57, %58 : vector<8x32xf32>
    %60 = vector.broadcast %19 : vector<1x32xf32> to vector<8x32xf32>
    %61 = arith.mulf %34, %60 : vector<8x32xf32>
    %62 = arith.addf %59, %61 : vector<8x32xf32>
    %63 = vector.broadcast %5 : vector<1x32xf32> to vector<8x32xf32>
    %64 = arith.mulf %49, %63 : vector<8x32xf32>
    %cst_31 = arith.constant dense<0.000000e+00> : vector<8xf32>
    %65 = vector.multi_reduction <add>, %64, %cst_31 [1] : vector<8x32xf32> to vector<8xf32>
    %66 = vector.shape_cast %65 : vector<8xf32> to vector<8x1xf32>
    %67 = vector.broadcast %5 : vector<1x32xf32> to vector<8x32xf32>
    %68 = arith.mulf %54, %67 : vector<8x32xf32>
    %cst_32 = arith.constant dense<0.000000e+00> : vector<8xf32>
    %69 = vector.multi_reduction <add>, %68, %cst_32 [1] : vector<8x32xf32> to vector<8xf32>
    %70 = vector.shape_cast %69 : vector<8xf32> to vector<8x1xf32>
    %71 = vector.broadcast %5 : vector<1x32xf32> to vector<8x32xf32>
    %72 = arith.mulf %62, %71 : vector<8x32xf32>
    %cst_33 = arith.constant dense<0.000000e+00> : vector<8xf32>
    %73 = vector.multi_reduction <add>, %72, %cst_33 [1] : vector<8x32xf32> to vector<8xf32>
    %74 = vector.shape_cast %73 : vector<8xf32> to vector<8x1xf32>
    %75 = arith.mulf %44, %66 : vector<8x1xf32>
    %cst_34 = arith.constant -2.000000e+00 : f32
    %76 = vector.broadcast %cst_34 : f32 to vector<8x1xf32>
    %77 = arith.mulf %76, %41 : vector<8x1xf32>
    %78 = arith.mulf %77, %75 : vector<8x1xf32>
    %79 = arith.mulf %44, %70 : vector<8x1xf32>
    %cst_35 = arith.constant -2.000000e+00 : f32
    %80 = vector.broadcast %cst_35 : f32 to vector<8x1xf32>
    %81 = arith.mulf %80, %41 : vector<8x1xf32>
    %82 = arith.mulf %81, %79 : vector<8x1xf32>
    %83 = arith.mulf %82, %70 : vector<8x1xf32>
    %84 = arith.mulf %44, %74 : vector<8x1xf32>
    %85 = arith.addf %83, %84 : vector<8x1xf32>
    %86 = vector.broadcast %78 : vector<8x1xf32> to vector<8x32xf32>
    %87 = arith.mulf %86, %46 : vector<8x32xf32>
    %88 = vector.broadcast %5 : vector<1x32xf32> to vector<8x32xf32>
    %89 = arith.mulf %52, %88 : vector<8x32xf32>
    %90 = vector.broadcast %44 : vector<8x1xf32> to vector<8x32xf32>
    %91 = arith.mulf %90, %89 : vector<8x32xf32>
    %92 = arith.addf %87, %91 : vector<8x32xf32>
    %93 = tpu.concatenate %48, %92 in 0 : vector<8x32xf32>, vector<8x32xf32> -> vector<16x32xf32>
    %cst_36 = arith.constant dense<0.000000e+00> : vector<16x32xf32>
    %94 = tpu.matmul %93, %4, %cst_36 {dimension_numbers = #tpu.dot_dimension_numbers<[1], [0], [0], [1], [0, 0, 1, 1], [], []>} : vector<16x32xf32>, vector<32x32xf32>, vector<16x32xf32> -> vector<16x32xf32>
    %95 = vector.extract_strided_slice %94 {offsets = [0, 0], sizes = [8, 32], strides = [1, 1]} : vector<16x32xf32> to vector<8x32xf32>
    %96 = arith.mulf %95, %17 : vector<8x32xf32>
    %97 = vector.extract_strided_slice %94 {offsets = [8, 0], sizes = [8, 32], strides = [1, 1]} : vector<16x32xf32> to vector<8x32xf32>
    %98 = arith.mulf %97, %17 : vector<8x32xf32>
    %99 = vector.extract_strided_slice %94 {offsets = [0, 0], sizes = [8, 32], strides = [1, 1]} : vector<16x32xf32> to vector<8x32xf32>
    %100 = arith.mulf %99, %24 : vector<8x32xf32>
    %101 = arith.addf %98, %100 : vector<8x32xf32>
    %102 = tpu.concatenate %96, %101 in 0 : vector<8x32xf32>, vector<8x32xf32> -> vector<16x32xf32>
    %cst_37 = arith.constant dense<0.000000e+00> : vector<16x32xf32>
    %103 = tpu.matmul %102, %1, %cst_37 {dimension_numbers = #tpu.dot_dimension_numbers<[1], [0], [0], [1], [0, 0, 1, 1], [], []>} : vector<16x32xf32>, vector<32x32xf32>, vector<16x32xf32> -> vector<16x32xf32>
    %104 = vector.extract_strided_slice %103 {offsets = [0, 0], sizes = [8, 32], strides = [1, 1]} : vector<16x32xf32> to vector<8x32xf32>
    %105 = vector.extract_strided_slice %103 {offsets = [8, 0], sizes = [8, 32], strides = [1, 1]} : vector<16x32xf32> to vector<8x32xf32>
    %106 = arith.addf %8, %104 : vector<8x32xf32>
    %cst_38 = arith.constant dense<0.000000e+00> : vector<1xf32>
    %107 = vector.multi_reduction <add>, %85, %cst_38 [0] : vector<8x1xf32> to vector<1xf32>
    %108 = vector.shape_cast %107 : vector<1xf32> to vector<1x1xf32>
    %109 = vector.broadcast %7 : vector<1x1xf32> to vector<8x32xf32>
    %110 = arith.mulf %109, %105 : vector<8x32xf32>
    %111 = vector.broadcast %108 : vector<1x1xf32> to vector<8x32xf32>
    %112 = arith.subf %111, %110 : vector<8x32xf32>
    %113 = arith.mulf %112, %112 : vector<8x32xf32>
    %114 = vector.shape_cast %113 : vector<8x32xf32> to vector<1x8x32xf32>
    %cst_39 = arith.constant dense<0.000000e+00> : vector<1xf32>
    %115 = vector.multi_reduction <add>, %114, %cst_39 [1, 2] : vector<1x8x32xf32> to vector<1xf32>
    %116 = vector.shape_cast %115 : vector<1xf32> to vector<1x1x1xf32>
    %117 = vector.extract %116[0, 0, 0] : f32 from vector<1x1x1xf32>
    %118 = vector.broadcast %117 : f32 to vector<1x1xf32>
    %119 = arith.addf %9, %118 : vector<1x1xf32>
    %120 = arith.mulf %104, %104 : vector<8x32xf32>
    %121 = vector.shape_cast %120 : vector<8x32xf32> to vector<1x8x32xf32>
    %cst_40 = arith.constant dense<0.000000e+00> : vector<1xf32>
    %122 = vector.multi_reduction <add>, %121, %cst_40 [1, 2] : vector<1x8x32xf32> to vector<1xf32>
    %123 = vector.shape_cast %122 : vector<1xf32> to vector<1x1x1xf32>
    %124 = vector.extract %123[0, 0, 0] : f32 from vector<1x1x1xf32>
    %125 = vector.broadcast %124 : f32 to vector<1x1xf32>
    %cst_41 = arith.constant 2.560000e+02 : f32
    %126 = vector.broadcast %cst_41 : f32 to vector<1x1xf32>
    %127 = arith.divf %125, %126 : vector<1x1xf32>
    %c0_42 = arith.constant 0 : index
    %c0_43 = arith.constant 0 : index
    %128 = vector.load %arg16[%c0_42, %c0_43] : memref<1x1xf32, #tpu.memory_space<vmem>>, vector<1x1xf32>
    tpu.vector_store %arg16[%c0_42, %c0_43], %127 {strides = array<i32>} : memref<1x1xf32, #tpu.memory_space<vmem>>, vector<1x1xf32>,
    %c0_i32 = arith.constant 0 : i32
    %129 = arith.cmpi eq, %0, %c0_i32 : i32
    %130 = arith.extui %129 : i1 to i32
    %c0_i32_44 = arith.constant 0 : i32
    %131 = arith.cmpi ne, %130, %c0_i32_44 : i32
    scf.if %131 {
      %c0_137 = arith.constant 0 : index
      %c0_138 = arith.constant 0 : index
      %518 = vector.load %arg14[%c0_137, %c0_138] : memref<8x32xf32, #tpu.memory_space<vmem>>, vector<8x32xf32>
      tpu.vector_store %arg14[%c0_137, %c0_138], %106 {strides = array<i32>} : memref<8x32xf32, #tpu.memory_space<vmem>>, vector<8x32xf32>,
      %c0_139 = arith.constant 0 : index
      %c0_140 = arith.constant 0 : index
      %519 = vector.load %arg15[%c0_139, %c0_140] : memref<8x1xf32, #tpu.memory_space<vmem>>, vector<8x1xf32>
      tpu.vector_store %arg15[%c0_139, %c0_140], %41 {strides = array<i32>} : memref<8x1xf32, #tpu.memory_space<vmem>>, vector<8x1xf32>,
    } else {
    }
    %c1 = arith.constant 1 : index
    %c0_45 = arith.constant 0 : index
    %132 = vector.load %arg10[%c1, %c0_45] : memref<5x32xf32, #tpu.memory_space<vmem>>, vector<1x32xf32>
    %cst_46 = arith.constant dense<0.000000e+00> : vector<8x32xf32>
    %133 = tpu.matmul %106, %1, %cst_46 {dimension_numbers = #tpu.dot_dimension_numbers<[1], [1], [0], [0], [0, 0, 1, 0], [], []>} : vector<8x32xf32>, vector<32x32xf32>, vector<8x32xf32> -> vector<8x32xf32>
    %134 = vector.broadcast %2 : vector<1x32xf32> to vector<8x32xf32>
    %135 = arith.addf %133, %134 : vector<8x32xf32>
    %136 = math.tanh %135 : vector<8x32xf32>
    %137 = arith.mulf %136, %136 : vector<8x32xf32>
    %cst_47 = arith.constant 1.000000e+00 : f32
    %138 = vector.broadcast %cst_47 : f32 to vector<8x32xf32>
    %139 = arith.subf %138, %137 : vector<8x32xf32>
    %c1_48 = arith.constant 1 : index
    %c0_49 = arith.constant 0 : index
    %140 = vector.load %arg11[%c1_48, %c0_49] : memref<5x32xf32, #tpu.memory_space<vmem>>, vector<1x32xf32>
    %c1_50 = arith.constant 1 : index
    %c0_51 = arith.constant 0 : index
    %141 = vector.load %arg12[%c1_50, %c0_51] : memref<5x32xf32, #tpu.memory_space<vmem>>, vector<1x32xf32>
    %142 = vector.broadcast %3 : vector<1x32xf32> to vector<8x32xf32>
    %143 = arith.mulf %139, %142 : vector<8x32xf32>
    %cst_52 = arith.constant -2.000000e+00 : f32
    %144 = vector.broadcast %cst_52 : f32 to vector<8x32xf32>
    %145 = arith.mulf %144, %136 : vector<8x32xf32>
    %146 = arith.mulf %145, %143 : vector<8x32xf32>
    %147 = tpu.concatenate %136, %143 in 0 : vector<8x32xf32>, vector<8x32xf32> -> vector<16x32xf32>
    %cst_53 = arith.constant dense<0.000000e+00> : vector<16x32xf32>
    %148 = tpu.matmul %147, %4, %cst_53 {dimension_numbers = #tpu.dot_dimension_numbers<[1], [1], [0], [0], [0, 0, 1, 0], [], []>} : vector<16x32xf32>, vector<32x32xf32>, vector<16x32xf32> -> vector<16x32xf32>
    %149 = vector.extract_strided_slice %148 {offsets = [0, 0], sizes = [8, 32], strides = [1, 1]} : vector<16x32xf32> to vector<8x32xf32>
    %150 = vector.broadcast %132 : vector<1x32xf32> to vector<8x32xf32>
    %151 = arith.addf %149, %150 : vector<8x32xf32>
    %152 = vector.extract_strided_slice %148 {offsets = [8, 0], sizes = [8, 32], strides = [1, 1]} : vector<16x32xf32> to vector<8x32xf32>
    %153 = math.tanh %151 : vector<8x32xf32>
    %154 = arith.mulf %153, %153 : vector<8x32xf32>
    %cst_54 = arith.constant 1.000000e+00 : f32
    %155 = vector.broadcast %cst_54 : f32 to vector<8x32xf32>
    %156 = arith.subf %155, %154 : vector<8x32xf32>
    %157 = vector.broadcast %5 : vector<1x32xf32> to vector<8x32xf32>
    %158 = arith.mulf %153, %157 : vector<8x32xf32>
    %cst_55 = arith.constant dense<0.000000e+00> : vector<8xf32>
    %159 = vector.multi_reduction <add>, %158, %cst_55 [1] : vector<8x32xf32> to vector<8xf32>
    %160 = vector.shape_cast %159 : vector<8xf32> to vector<8x1xf32>
    %161 = vector.broadcast %6 : vector<1x1xf32> to vector<8x1xf32>
    %162 = arith.addf %160, %161 : vector<8x1xf32>
    %163 = math.tanh %162 : vector<8x1xf32>
    %164 = arith.mulf %163, %163 : vector<8x1xf32>
    %cst_56 = arith.constant 1.000000e+00 : f32
    %165 = vector.broadcast %cst_56 : f32 to vector<8x1xf32>
    %166 = arith.subf %165, %164 : vector<8x1xf32>
    %167 = vector.broadcast %5 : vector<1x32xf32> to vector<8x32xf32>
    %168 = arith.mulf %156, %167 : vector<8x32xf32>
    %169 = vector.broadcast %166 : vector<8x1xf32> to vector<8x32xf32>
    %170 = arith.mulf %169, %168 : vector<8x32xf32>
    %171 = arith.mulf %156, %152 : vector<8x32xf32>
    %cst_57 = arith.constant -2.000000e+00 : f32
    %172 = vector.broadcast %cst_57 : f32 to vector<8x32xf32>
    %173 = arith.mulf %172, %153 : vector<8x32xf32>
    %174 = arith.mulf %173, %171 : vector<8x32xf32>
    %175 = vector.broadcast %140 : vector<1x32xf32> to vector<8x32xf32>
    %176 = arith.mulf %156, %175 : vector<8x32xf32>
    %cst_58 = arith.constant -2.000000e+00 : f32
    %177 = vector.broadcast %cst_58 : f32 to vector<8x32xf32>
    %178 = arith.mulf %177, %153 : vector<8x32xf32>
    %179 = arith.mulf %178, %176 : vector<8x32xf32>
    %180 = vector.broadcast %140 : vector<1x32xf32> to vector<8x32xf32>
    %181 = arith.mulf %179, %180 : vector<8x32xf32>
    %182 = vector.broadcast %141 : vector<1x32xf32> to vector<8x32xf32>
    %183 = arith.mulf %156, %182 : vector<8x32xf32>
    %184 = arith.addf %181, %183 : vector<8x32xf32>
    %185 = vector.broadcast %5 : vector<1x32xf32> to vector<8x32xf32>
    %186 = arith.mulf %171, %185 : vector<8x32xf32>
    %cst_59 = arith.constant dense<0.000000e+00> : vector<8xf32>
    %187 = vector.multi_reduction <add>, %186, %cst_59 [1] : vector<8x32xf32> to vector<8xf32>
    %188 = vector.shape_cast %187 : vector<8xf32> to vector<8x1xf32>
    %189 = vector.broadcast %5 : vector<1x32xf32> to vector<8x32xf32>
    %190 = arith.mulf %176, %189 : vector<8x32xf32>
    %cst_60 = arith.constant dense<0.000000e+00> : vector<8xf32>
    %191 = vector.multi_reduction <add>, %190, %cst_60 [1] : vector<8x32xf32> to vector<8xf32>
    %192 = vector.shape_cast %191 : vector<8xf32> to vector<8x1xf32>
    %193 = vector.broadcast %5 : vector<1x32xf32> to vector<8x32xf32>
    %194 = arith.mulf %184, %193 : vector<8x32xf32>
    %cst_61 = arith.constant dense<0.000000e+00> : vector<8xf32>
    %195 = vector.multi_reduction <add>, %194, %cst_61 [1] : vector<8x32xf32> to vector<8xf32>
    %196 = vector.shape_cast %195 : vector<8xf32> to vector<8x1xf32>
    %197 = arith.mulf %166, %188 : vector<8x1xf32>
    %cst_62 = arith.constant -2.000000e+00 : f32
    %198 = vector.broadcast %cst_62 : f32 to vector<8x1xf32>
    %199 = arith.mulf %198, %163 : vector<8x1xf32>
    %200 = arith.mulf %199, %197 : vector<8x1xf32>
    %201 = arith.mulf %166, %192 : vector<8x1xf32>
    %cst_63 = arith.constant -2.000000e+00 : f32
    %202 = vector.broadcast %cst_63 : f32 to vector<8x1xf32>
    %203 = arith.mulf %202, %163 : vector<8x1xf32>
    %204 = arith.mulf %203, %201 : vector<8x1xf32>
    %205 = arith.mulf %204, %192 : vector<8x1xf32>
    %206 = arith.mulf %166, %196 : vector<8x1xf32>
    %207 = arith.addf %205, %206 : vector<8x1xf32>
    %208 = vector.broadcast %200 : vector<8x1xf32> to vector<8x32xf32>
    %209 = arith.mulf %208, %168 : vector<8x32xf32>
    %210 = vector.broadcast %5 : vector<1x32xf32> to vector<8x32xf32>
    %211 = arith.mulf %174, %210 : vector<8x32xf32>
    %212 = vector.broadcast %166 : vector<8x1xf32> to vector<8x32xf32>
    %213 = arith.mulf %212, %211 : vector<8x32xf32>
    %214 = arith.addf %209, %213 : vector<8x32xf32>
    %215 = tpu.concatenate %170, %214 in 0 : vector<8x32xf32>, vector<8x32xf32> -> vector<16x32xf32>
    %cst_64 = arith.constant dense<0.000000e+00> : vector<16x32xf32>
    %216 = tpu.matmul %215, %4, %cst_64 {dimension_numbers = #tpu.dot_dimension_numbers<[1], [0], [0], [1], [0, 0, 1, 1], [], []>} : vector<16x32xf32>, vector<32x32xf32>, vector<16x32xf32> -> vector<16x32xf32>
    %217 = vector.extract_strided_slice %216 {offsets = [0, 0], sizes = [8, 32], strides = [1, 1]} : vector<16x32xf32> to vector<8x32xf32>
    %218 = arith.mulf %217, %139 : vector<8x32xf32>
    %219 = vector.extract_strided_slice %216 {offsets = [8, 0], sizes = [8, 32], strides = [1, 1]} : vector<16x32xf32> to vector<8x32xf32>
    %220 = arith.mulf %219, %139 : vector<8x32xf32>
    %221 = vector.extract_strided_slice %216 {offsets = [0, 0], sizes = [8, 32], strides = [1, 1]} : vector<16x32xf32> to vector<8x32xf32>
    %222 = arith.mulf %221, %146 : vector<8x32xf32>
    %223 = arith.addf %220, %222 : vector<8x32xf32>
    %224 = tpu.concatenate %218, %223 in 0 : vector<8x32xf32>, vector<8x32xf32> -> vector<16x32xf32>
    %cst_65 = arith.constant dense<0.000000e+00> : vector<16x32xf32>
    %225 = tpu.matmul %224, %1, %cst_65 {dimension_numbers = #tpu.dot_dimension_numbers<[1], [0], [0], [1], [0, 0, 1, 1], [], []>} : vector<16x32xf32>, vector<32x32xf32>, vector<16x32xf32> -> vector<16x32xf32>
    %226 = vector.extract_strided_slice %225 {offsets = [0, 0], sizes = [8, 32], strides = [1, 1]} : vector<16x32xf32> to vector<8x32xf32>
    %227 = vector.extract_strided_slice %225 {offsets = [8, 0], sizes = [8, 32], strides = [1, 1]} : vector<16x32xf32> to vector<8x32xf32>
    %228 = arith.addf %106, %226 : vector<8x32xf32>
    %cst_66 = arith.constant dense<0.000000e+00> : vector<1xf32>
    %229 = vector.multi_reduction <add>, %207, %cst_66 [0] : vector<8x1xf32> to vector<1xf32>
    %230 = vector.shape_cast %229 : vector<1xf32> to vector<1x1xf32>
    %231 = vector.broadcast %7 : vector<1x1xf32> to vector<8x32xf32>
    %232 = arith.mulf %231, %227 : vector<8x32xf32>
    %233 = vector.broadcast %230 : vector<1x1xf32> to vector<8x32xf32>
    %234 = arith.subf %233, %232 : vector<8x32xf32>
    %235 = arith.mulf %234, %234 : vector<8x32xf32>
    %236 = vector.shape_cast %235 : vector<8x32xf32> to vector<1x8x32xf32>
    %cst_67 = arith.constant dense<0.000000e+00> : vector<1xf32>
    %237 = vector.multi_reduction <add>, %236, %cst_67 [1, 2] : vector<1x8x32xf32> to vector<1xf32>
    %238 = vector.shape_cast %237 : vector<1xf32> to vector<1x1x1xf32>
    %239 = vector.extract %238[0, 0, 0] : f32 from vector<1x1x1xf32>
    %240 = vector.broadcast %239 : f32 to vector<1x1xf32>
    %241 = arith.addf %119, %240 : vector<1x1xf32>
    %c1_i32 = arith.constant 1 : i32
    %242 = arith.cmpi eq, %0, %c1_i32 : i32
    %243 = arith.extui %242 : i1 to i32
    %c0_i32_68 = arith.constant 0 : i32
    %244 = arith.cmpi ne, %243, %c0_i32_68 : i32
    scf.if %244 {
      %c0_137 = arith.constant 0 : index
      %c0_138 = arith.constant 0 : index
      %518 = vector.load %arg14[%c0_137, %c0_138] : memref<8x32xf32, #tpu.memory_space<vmem>>, vector<8x32xf32>
      tpu.vector_store %arg14[%c0_137, %c0_138], %228 {strides = array<i32>} : memref<8x32xf32, #tpu.memory_space<vmem>>, vector<8x32xf32>,
      %c0_139 = arith.constant 0 : index
      %c0_140 = arith.constant 0 : index
      %519 = vector.load %arg15[%c0_139, %c0_140] : memref<8x1xf32, #tpu.memory_space<vmem>>, vector<8x1xf32>
      tpu.vector_store %arg15[%c0_139, %c0_140], %163 {strides = array<i32>} : memref<8x1xf32, #tpu.memory_space<vmem>>, vector<8x1xf32>,
    } else {
    }
    %c0_i32_69 = arith.constant 0 : i32
    %245 = arith.cmpi eq, %0, %c0_i32_69 : i32
    %246 = arith.extui %245 : i1 to i32
    %c0_i32_70 = arith.constant 0 : i32
    %247 = arith.cmpi ne, %246, %c0_i32_70 : i32
    scf.if %247 {
      %c0_137 = arith.constant 0 : index
      %c0_138 = arith.constant 0 : index
      %518 = vector.load %arg13[%c0_137, %c0_138] : memref<8x32xf32, #tpu.memory_space<vmem>>, vector<8x32xf32>
      tpu.vector_store %arg13[%c0_137, %c0_138], %226 {strides = array<i32>} : memref<8x32xf32, #tpu.memory_space<vmem>>, vector<8x32xf32>,
    } else {
    }
    %c2 = arith.constant 2 : index
    %c0_71 = arith.constant 0 : index
    %248 = vector.load %arg10[%c2, %c0_71] : memref<5x32xf32, #tpu.memory_space<vmem>>, vector<1x32xf32>
    %cst_72 = arith.constant dense<0.000000e+00> : vector<8x32xf32>
    %249 = tpu.matmul %228, %1, %cst_72 {dimension_numbers = #tpu.dot_dimension_numbers<[1], [1], [0], [0], [0, 0, 1, 0], [], []>} : vector<8x32xf32>, vector<32x32xf32>, vector<8x32xf32> -> vector<8x32xf32>
    %250 = vector.broadcast %2 : vector<1x32xf32> to vector<8x32xf32>
    %251 = arith.addf %249, %250 : vector<8x32xf32>
    %252 = math.tanh %251 : vector<8x32xf32>
    %253 = arith.mulf %252, %252 : vector<8x32xf32>
    %cst_73 = arith.constant 1.000000e+00 : f32
    %254 = vector.broadcast %cst_73 : f32 to vector<8x32xf32>
    %255 = arith.subf %254, %253 : vector<8x32xf32>
    %c2_74 = arith.constant 2 : index
    %c0_75 = arith.constant 0 : index
    %256 = vector.load %arg11[%c2_74, %c0_75] : memref<5x32xf32, #tpu.memory_space<vmem>>, vector<1x32xf32>
    %c2_76 = arith.constant 2 : index
    %c0_77 = arith.constant 0 : index
    %257 = vector.load %arg12[%c2_76, %c0_77] : memref<5x32xf32, #tpu.memory_space<vmem>>, vector<1x32xf32>
    %258 = vector.broadcast %3 : vector<1x32xf32> to vector<8x32xf32>
    %259 = arith.mulf %255, %258 : vector<8x32xf32>
    %cst_78 = arith.constant -2.000000e+00 : f32
    %260 = vector.broadcast %cst_78 : f32 to vector<8x32xf32>
    %261 = arith.mulf %260, %252 : vector<8x32xf32>
    %262 = arith.mulf %261, %259 : vector<8x32xf32>
    %263 = tpu.concatenate %252, %259 in 0 : vector<8x32xf32>, vector<8x32xf32> -> vector<16x32xf32>
    %cst_79 = arith.constant dense<0.000000e+00> : vector<16x32xf32>
    %264 = tpu.matmul %263, %4, %cst_79 {dimension_numbers = #tpu.dot_dimension_numbers<[1], [1], [0], [0], [0, 0, 1, 0], [], []>} : vector<16x32xf32>, vector<32x32xf32>, vector<16x32xf32> -> vector<16x32xf32>
    %265 = vector.extract_strided_slice %264 {offsets = [0, 0], sizes = [8, 32], strides = [1, 1]} : vector<16x32xf32> to vector<8x32xf32>
    %266 = vector.broadcast %248 : vector<1x32xf32> to vector<8x32xf32>
    %267 = arith.addf %265, %266 : vector<8x32xf32>
    %268 = vector.extract_strided_slice %264 {offsets = [8, 0], sizes = [8, 32], strides = [1, 1]} : vector<16x32xf32> to vector<8x32xf32>
    %269 = math.tanh %267 : vector<8x32xf32>
    %270 = arith.mulf %269, %269 : vector<8x32xf32>
    %cst_80 = arith.constant 1.000000e+00 : f32
    %271 = vector.broadcast %cst_80 : f32 to vector<8x32xf32>
    %272 = arith.subf %271, %270 : vector<8x32xf32>
    %273 = vector.broadcast %5 : vector<1x32xf32> to vector<8x32xf32>
    %274 = arith.mulf %269, %273 : vector<8x32xf32>
    %cst_81 = arith.constant dense<0.000000e+00> : vector<8xf32>
    %275 = vector.multi_reduction <add>, %274, %cst_81 [1] : vector<8x32xf32> to vector<8xf32>
    %276 = vector.shape_cast %275 : vector<8xf32> to vector<8x1xf32>
    %277 = vector.broadcast %6 : vector<1x1xf32> to vector<8x1xf32>
    %278 = arith.addf %276, %277 : vector<8x1xf32>
    %279 = math.tanh %278 : vector<8x1xf32>
    %280 = arith.mulf %279, %279 : vector<8x1xf32>
    %cst_82 = arith.constant 1.000000e+00 : f32
    %281 = vector.broadcast %cst_82 : f32 to vector<8x1xf32>
    %282 = arith.subf %281, %280 : vector<8x1xf32>
    %283 = vector.broadcast %5 : vector<1x32xf32> to vector<8x32xf32>
    %284 = arith.mulf %272, %283 : vector<8x32xf32>
    %285 = vector.broadcast %282 : vector<8x1xf32> to vector<8x32xf32>
    %286 = arith.mulf %285, %284 : vector<8x32xf32>
    %287 = arith.mulf %272, %268 : vector<8x32xf32>
    %cst_83 = arith.constant -2.000000e+00 : f32
    %288 = vector.broadcast %cst_83 : f32 to vector<8x32xf32>
    %289 = arith.mulf %288, %269 : vector<8x32xf32>
    %290 = arith.mulf %289, %287 : vector<8x32xf32>
    %291 = vector.broadcast %256 : vector<1x32xf32> to vector<8x32xf32>
    %292 = arith.mulf %272, %291 : vector<8x32xf32>
    %cst_84 = arith.constant -2.000000e+00 : f32
    %293 = vector.broadcast %cst_84 : f32 to vector<8x32xf32>
    %294 = arith.mulf %293, %269 : vector<8x32xf32>
    %295 = arith.mulf %294, %292 : vector<8x32xf32>
    %296 = vector.broadcast %256 : vector<1x32xf32> to vector<8x32xf32>
    %297 = arith.mulf %295, %296 : vector<8x32xf32>
    %298 = vector.broadcast %257 : vector<1x32xf32> to vector<8x32xf32>
    %299 = arith.mulf %272, %298 : vector<8x32xf32>
    %300 = arith.addf %297, %299 : vector<8x32xf32>
    %301 = vector.broadcast %5 : vector<1x32xf32> to vector<8x32xf32>
    %302 = arith.mulf %287, %301 : vector<8x32xf32>
    %cst_85 = arith.constant dense<0.000000e+00> : vector<8xf32>
    %303 = vector.multi_reduction <add>, %302, %cst_85 [1] : vector<8x32xf32> to vector<8xf32>
    %304 = vector.shape_cast %303 : vector<8xf32> to vector<8x1xf32>
    %305 = vector.broadcast %5 : vector<1x32xf32> to vector<8x32xf32>
    %306 = arith.mulf %292, %305 : vector<8x32xf32>
    %cst_86 = arith.constant dense<0.000000e+00> : vector<8xf32>
    %307 = vector.multi_reduction <add>, %306, %cst_86 [1] : vector<8x32xf32> to vector<8xf32>
    %308 = vector.shape_cast %307 : vector<8xf32> to vector<8x1xf32>
    %309 = vector.broadcast %5 : vector<1x32xf32> to vector<8x32xf32>
    %310 = arith.mulf %300, %309 : vector<8x32xf32>
    %cst_87 = arith.constant dense<0.000000e+00> : vector<8xf32>
    %311 = vector.multi_reduction <add>, %310, %cst_87 [1] : vector<8x32xf32> to vector<8xf32>
    %312 = vector.shape_cast %311 : vector<8xf32> to vector<8x1xf32>
    %313 = arith.mulf %282, %304 : vector<8x1xf32>
    %cst_88 = arith.constant -2.000000e+00 : f32
    %314 = vector.broadcast %cst_88 : f32 to vector<8x1xf32>
    %315 = arith.mulf %314, %279 : vector<8x1xf32>
    %316 = arith.mulf %315, %313 : vector<8x1xf32>
    %317 = arith.mulf %282, %308 : vector<8x1xf32>
    %cst_89 = arith.constant -2.000000e+00 : f32
    %318 = vector.broadcast %cst_89 : f32 to vector<8x1xf32>
    %319 = arith.mulf %318, %279 : vector<8x1xf32>
    %320 = arith.mulf %319, %317 : vector<8x1xf32>
    %321 = arith.mulf %320, %308 : vector<8x1xf32>
    %322 = arith.mulf %282, %312 : vector<8x1xf32>
    %323 = arith.addf %321, %322 : vector<8x1xf32>
    %324 = vector.broadcast %316 : vector<8x1xf32> to vector<8x32xf32>
    %325 = arith.mulf %324, %284 : vector<8x32xf32>
    %326 = vector.broadcast %5 : vector<1x32xf32> to vector<8x32xf32>
    %327 = arith.mulf %290, %326 : vector<8x32xf32>
    %328 = vector.broadcast %282 : vector<8x1xf32> to vector<8x32xf32>
    %329 = arith.mulf %328, %327 : vector<8x32xf32>
    %330 = arith.addf %325, %329 : vector<8x32xf32>
    %331 = tpu.concatenate %286, %330 in 0 : vector<8x32xf32>, vector<8x32xf32> -> vector<16x32xf32>
    %cst_90 = arith.constant dense<0.000000e+00> : vector<16x32xf32>
    %332 = tpu.matmul %331, %4, %cst_90 {dimension_numbers = #tpu.dot_dimension_numbers<[1], [0], [0], [1], [0, 0, 1, 1], [], []>} : vector<16x32xf32>, vector<32x32xf32>, vector<16x32xf32> -> vector<16x32xf32>
    %333 = vector.extract_strided_slice %332 {offsets = [0, 0], sizes = [8, 32], strides = [1, 1]} : vector<16x32xf32> to vector<8x32xf32>
    %334 = arith.mulf %333, %255 : vector<8x32xf32>
    %335 = vector.extract_strided_slice %332 {offsets = [8, 0], sizes = [8, 32], strides = [1, 1]} : vector<16x32xf32> to vector<8x32xf32>
    %336 = arith.mulf %335, %255 : vector<8x32xf32>
    %337 = vector.extract_strided_slice %332 {offsets = [0, 0], sizes = [8, 32], strides = [1, 1]} : vector<16x32xf32> to vector<8x32xf32>
    %338 = arith.mulf %337, %262 : vector<8x32xf32>
    %339 = arith.addf %336, %338 : vector<8x32xf32>
    %340 = tpu.concatenate %334, %339 in 0 : vector<8x32xf32>, vector<8x32xf32> -> vector<16x32xf32>
    %cst_91 = arith.constant dense<0.000000e+00> : vector<16x32xf32>
    %341 = tpu.matmul %340, %1, %cst_91 {dimension_numbers = #tpu.dot_dimension_numbers<[1], [0], [0], [1], [0, 0, 1, 1], [], []>} : vector<16x32xf32>, vector<32x32xf32>, vector<16x32xf32> -> vector<16x32xf32>
    %342 = vector.extract_strided_slice %341 {offsets = [0, 0], sizes = [8, 32], strides = [1, 1]} : vector<16x32xf32> to vector<8x32xf32>
    %343 = vector.extract_strided_slice %341 {offsets = [8, 0], sizes = [8, 32], strides = [1, 1]} : vector<16x32xf32> to vector<8x32xf32>
    %344 = arith.addf %228, %342 : vector<8x32xf32>
    %cst_92 = arith.constant dense<0.000000e+00> : vector<1xf32>
    %345 = vector.multi_reduction <add>, %323, %cst_92 [0] : vector<8x1xf32> to vector<1xf32>
    %346 = vector.shape_cast %345 : vector<1xf32> to vector<1x1xf32>
    %347 = vector.broadcast %7 : vector<1x1xf32> to vector<8x32xf32>
    %348 = arith.mulf %347, %343 : vector<8x32xf32>
    %349 = vector.broadcast %346 : vector<1x1xf32> to vector<8x32xf32>
    %350 = arith.subf %349, %348 : vector<8x32xf32>
    %351 = arith.mulf %350, %350 : vector<8x32xf32>
    %352 = vector.shape_cast %351 : vector<8x32xf32> to vector<1x8x32xf32>
    %cst_93 = arith.constant dense<0.000000e+00> : vector<1xf32>
    %353 = vector.multi_reduction <add>, %352, %cst_93 [1, 2] : vector<1x8x32xf32> to vector<1xf32>
    %354 = vector.shape_cast %353 : vector<1xf32> to vector<1x1x1xf32>
    %355 = vector.extract %354[0, 0, 0] : f32 from vector<1x1x1xf32>
    %356 = vector.broadcast %355 : f32 to vector<1x1xf32>
    %357 = arith.addf %241, %356 : vector<1x1xf32>
    %c2_i32 = arith.constant 2 : i32
    %358 = arith.cmpi eq, %0, %c2_i32 : i32
    %359 = arith.extui %358 : i1 to i32
    %c0_i32_94 = arith.constant 0 : i32
    %360 = arith.cmpi ne, %359, %c0_i32_94 : i32
    scf.if %360 {
      %c0_137 = arith.constant 0 : index
      %c0_138 = arith.constant 0 : index
      %518 = vector.load %arg14[%c0_137, %c0_138] : memref<8x32xf32, #tpu.memory_space<vmem>>, vector<8x32xf32>
      tpu.vector_store %arg14[%c0_137, %c0_138], %344 {strides = array<i32>} : memref<8x32xf32, #tpu.memory_space<vmem>>, vector<8x32xf32>,
      %c0_139 = arith.constant 0 : index
      %c0_140 = arith.constant 0 : index
      %519 = vector.load %arg15[%c0_139, %c0_140] : memref<8x1xf32, #tpu.memory_space<vmem>>, vector<8x1xf32>
      tpu.vector_store %arg15[%c0_139, %c0_140], %279 {strides = array<i32>} : memref<8x1xf32, #tpu.memory_space<vmem>>, vector<8x1xf32>,
    } else {
    }
    %c1_i32_95 = arith.constant 1 : i32
    %361 = arith.cmpi eq, %0, %c1_i32_95 : i32
    %362 = arith.extui %361 : i1 to i32
    %c0_i32_96 = arith.constant 0 : i32
    %363 = arith.cmpi ne, %362, %c0_i32_96 : i32
    scf.if %363 {
      %c0_137 = arith.constant 0 : index
      %c0_138 = arith.constant 0 : index
      %518 = vector.load %arg13[%c0_137, %c0_138] : memref<8x32xf32, #tpu.memory_space<vmem>>, vector<8x32xf32>
      tpu.vector_store %arg13[%c0_137, %c0_138], %342 {strides = array<i32>} : memref<8x32xf32, #tpu.memory_space<vmem>>, vector<8x32xf32>,
    } else {
    }
    %c3 = arith.constant 3 : index
    %c0_97 = arith.constant 0 : index
    %364 = vector.load %arg10[%c3, %c0_97] : memref<5x32xf32, #tpu.memory_space<vmem>>, vector<1x32xf32>
    %cst_98 = arith.constant dense<0.000000e+00> : vector<8x32xf32>
    %365 = tpu.matmul %344, %1, %cst_98 {dimension_numbers = #tpu.dot_dimension_numbers<[1], [1], [0], [0], [0, 0, 1, 0], [], []>} : vector<8x32xf32>, vector<32x32xf32>, vector<8x32xf32> -> vector<8x32xf32>
    %366 = vector.broadcast %2 : vector<1x32xf32> to vector<8x32xf32>
    %367 = arith.addf %365, %366 : vector<8x32xf32>
    %368 = math.tanh %367 : vector<8x32xf32>
    %369 = arith.mulf %368, %368 : vector<8x32xf32>
    %cst_99 = arith.constant 1.000000e+00 : f32
    %370 = vector.broadcast %cst_99 : f32 to vector<8x32xf32>
    %371 = arith.subf %370, %369 : vector<8x32xf32>
    %c3_100 = arith.constant 3 : index
    %c0_101 = arith.constant 0 : index
    %372 = vector.load %arg11[%c3_100, %c0_101] : memref<5x32xf32, #tpu.memory_space<vmem>>, vector<1x32xf32>
    %c3_102 = arith.constant 3 : index
    %c0_103 = arith.constant 0 : index
    %373 = vector.load %arg12[%c3_102, %c0_103] : memref<5x32xf32, #tpu.memory_space<vmem>>, vector<1x32xf32>
    %374 = vector.broadcast %3 : vector<1x32xf32> to vector<8x32xf32>
    %375 = arith.mulf %371, %374 : vector<8x32xf32>
    %cst_104 = arith.constant -2.000000e+00 : f32
    %376 = vector.broadcast %cst_104 : f32 to vector<8x32xf32>
    %377 = arith.mulf %376, %368 : vector<8x32xf32>
    %378 = arith.mulf %377, %375 : vector<8x32xf32>
    %379 = tpu.concatenate %368, %375 in 0 : vector<8x32xf32>, vector<8x32xf32> -> vector<16x32xf32>
    %cst_105 = arith.constant dense<0.000000e+00> : vector<16x32xf32>
    %380 = tpu.matmul %379, %4, %cst_105 {dimension_numbers = #tpu.dot_dimension_numbers<[1], [1], [0], [0], [0, 0, 1, 0], [], []>} : vector<16x32xf32>, vector<32x32xf32>, vector<16x32xf32> -> vector<16x32xf32>
    %381 = vector.extract_strided_slice %380 {offsets = [0, 0], sizes = [8, 32], strides = [1, 1]} : vector<16x32xf32> to vector<8x32xf32>
    %382 = vector.broadcast %364 : vector<1x32xf32> to vector<8x32xf32>
    %383 = arith.addf %381, %382 : vector<8x32xf32>
    %384 = vector.extract_strided_slice %380 {offsets = [8, 0], sizes = [8, 32], strides = [1, 1]} : vector<16x32xf32> to vector<8x32xf32>
    %385 = math.tanh %383 : vector<8x32xf32>
    %386 = arith.mulf %385, %385 : vector<8x32xf32>
    %cst_106 = arith.constant 1.000000e+00 : f32
    %387 = vector.broadcast %cst_106 : f32 to vector<8x32xf32>
    %388 = arith.subf %387, %386 : vector<8x32xf32>
    %389 = vector.broadcast %5 : vector<1x32xf32> to vector<8x32xf32>
    %390 = arith.mulf %385, %389 : vector<8x32xf32>
    %cst_107 = arith.constant dense<0.000000e+00> : vector<8xf32>
    %391 = vector.multi_reduction <add>, %390, %cst_107 [1] : vector<8x32xf32> to vector<8xf32>
    %392 = vector.shape_cast %391 : vector<8xf32> to vector<8x1xf32>
    %393 = vector.broadcast %6 : vector<1x1xf32> to vector<8x1xf32>
    %394 = arith.addf %392, %393 : vector<8x1xf32>
    %395 = math.tanh %394 : vector<8x1xf32>
    %396 = arith.mulf %395, %395 : vector<8x1xf32>
    %cst_108 = arith.constant 1.000000e+00 : f32
    %397 = vector.broadcast %cst_108 : f32 to vector<8x1xf32>
    %398 = arith.subf %397, %396 : vector<8x1xf32>
    %399 = vector.broadcast %5 : vector<1x32xf32> to vector<8x32xf32>
    %400 = arith.mulf %388, %399 : vector<8x32xf32>
    %401 = vector.broadcast %398 : vector<8x1xf32> to vector<8x32xf32>
    %402 = arith.mulf %401, %400 : vector<8x32xf32>
    %403 = arith.mulf %388, %384 : vector<8x32xf32>
    %cst_109 = arith.constant -2.000000e+00 : f32
    %404 = vector.broadcast %cst_109 : f32 to vector<8x32xf32>
    %405 = arith.mulf %404, %385 : vector<8x32xf32>
    %406 = arith.mulf %405, %403 : vector<8x32xf32>
    %407 = vector.broadcast %372 : vector<1x32xf32> to vector<8x32xf32>
    %408 = arith.mulf %388, %407 : vector<8x32xf32>
    %cst_110 = arith.constant -2.000000e+00 : f32
    %409 = vector.broadcast %cst_110 : f32 to vector<8x32xf32>
    %410 = arith.mulf %409, %385 : vector<8x32xf32>
    %411 = arith.mulf %410, %408 : vector<8x32xf32>
    %412 = vector.broadcast %372 : vector<1x32xf32> to vector<8x32xf32>
    %413 = arith.mulf %411, %412 : vector<8x32xf32>
    %414 = vector.broadcast %373 : vector<1x32xf32> to vector<8x32xf32>
    %415 = arith.mulf %388, %414 : vector<8x32xf32>
    %416 = arith.addf %413, %415 : vector<8x32xf32>
    %417 = vector.broadcast %5 : vector<1x32xf32> to vector<8x32xf32>
    %418 = arith.mulf %403, %417 : vector<8x32xf32>
    %cst_111 = arith.constant dense<0.000000e+00> : vector<8xf32>
    %419 = vector.multi_reduction <add>, %418, %cst_111 [1] : vector<8x32xf32> to vector<8xf32>
    %420 = vector.shape_cast %419 : vector<8xf32> to vector<8x1xf32>
    %421 = vector.broadcast %5 : vector<1x32xf32> to vector<8x32xf32>
    %422 = arith.mulf %408, %421 : vector<8x32xf32>
    %cst_112 = arith.constant dense<0.000000e+00> : vector<8xf32>
    %423 = vector.multi_reduction <add>, %422, %cst_112 [1] : vector<8x32xf32> to vector<8xf32>
    %424 = vector.shape_cast %423 : vector<8xf32> to vector<8x1xf32>
    %425 = vector.broadcast %5 : vector<1x32xf32> to vector<8x32xf32>
    %426 = arith.mulf %416, %425 : vector<8x32xf32>
    %cst_113 = arith.constant dense<0.000000e+00> : vector<8xf32>
    %427 = vector.multi_reduction <add>, %426, %cst_113 [1] : vector<8x32xf32> to vector<8xf32>
    %428 = vector.shape_cast %427 : vector<8xf32> to vector<8x1xf32>
    %429 = arith.mulf %398, %420 : vector<8x1xf32>
    %cst_114 = arith.constant -2.000000e+00 : f32
    %430 = vector.broadcast %cst_114 : f32 to vector<8x1xf32>
    %431 = arith.mulf %430, %395 : vector<8x1xf32>
    %432 = arith.mulf %431, %429 : vector<8x1xf32>
    %433 = arith.mulf %398, %424 : vector<8x1xf32>
    %cst_115 = arith.constant -2.000000e+00 : f32
    %434 = vector.broadcast %cst_115 : f32 to vector<8x1xf32>
    %435 = arith.mulf %434, %395 : vector<8x1xf32>
    %436 = arith.mulf %435, %433 : vector<8x1xf32>
    %437 = arith.mulf %436, %424 : vector<8x1xf32>
    %438 = arith.mulf %398, %428 : vector<8x1xf32>
    %439 = arith.addf %437, %438 : vector<8x1xf32>
    %440 = vector.broadcast %432 : vector<8x1xf32> to vector<8x32xf32>
    %441 = arith.mulf %440, %400 : vector<8x32xf32>
    %442 = vector.broadcast %5 : vector<1x32xf32> to vector<8x32xf32>
    %443 = arith.mulf %406, %442 : vector<8x32xf32>
    %444 = vector.broadcast %398 : vector<8x1xf32> to vector<8x32xf32>
    %445 = arith.mulf %444, %443 : vector<8x32xf32>
    %446 = arith.addf %441, %445 : vector<8x32xf32>
    %447 = tpu.concatenate %402, %446 in 0 : vector<8x32xf32>, vector<8x32xf32> -> vector<16x32xf32>
    %cst_116 = arith.constant dense<0.000000e+00> : vector<16x32xf32>
    %448 = tpu.matmul %447, %4, %cst_116 {dimension_numbers = #tpu.dot_dimension_numbers<[1], [0], [0], [1], [0, 0, 1, 1], [], []>} : vector<16x32xf32>, vector<32x32xf32>, vector<16x32xf32> -> vector<16x32xf32>
    %449 = vector.extract_strided_slice %448 {offsets = [0, 0], sizes = [8, 32], strides = [1, 1]} : vector<16x32xf32> to vector<8x32xf32>
    %450 = arith.mulf %449, %371 : vector<8x32xf32>
    %451 = vector.extract_strided_slice %448 {offsets = [8, 0], sizes = [8, 32], strides = [1, 1]} : vector<16x32xf32> to vector<8x32xf32>
    %452 = arith.mulf %451, %371 : vector<8x32xf32>
    %453 = vector.extract_strided_slice %448 {offsets = [0, 0], sizes = [8, 32], strides = [1, 1]} : vector<16x32xf32> to vector<8x32xf32>
    %454 = arith.mulf %453, %378 : vector<8x32xf32>
    %455 = arith.addf %452, %454 : vector<8x32xf32>
    %456 = tpu.concatenate %450, %455 in 0 : vector<8x32xf32>, vector<8x32xf32> -> vector<16x32xf32>
    %cst_117 = arith.constant dense<0.000000e+00> : vector<16x32xf32>
    %457 = tpu.matmul %456, %1, %cst_117 {dimension_numbers = #tpu.dot_dimension_numbers<[1], [0], [0], [1], [0, 0, 1, 1], [], []>} : vector<16x32xf32>, vector<32x32xf32>, vector<16x32xf32> -> vector<16x32xf32>
    %458 = vector.extract_strided_slice %457 {offsets = [0, 0], sizes = [8, 32], strides = [1, 1]} : vector<16x32xf32> to vector<8x32xf32>
    %459 = vector.extract_strided_slice %457 {offsets = [8, 0], sizes = [8, 32], strides = [1, 1]} : vector<16x32xf32> to vector<8x32xf32>
    %460 = arith.addf %344, %458 : vector<8x32xf32>
    %cst_118 = arith.constant dense<0.000000e+00> : vector<1xf32>
    %461 = vector.multi_reduction <add>, %439, %cst_118 [0] : vector<8x1xf32> to vector<1xf32>
    %462 = vector.shape_cast %461 : vector<1xf32> to vector<1x1xf32>
    %463 = vector.broadcast %7 : vector<1x1xf32> to vector<8x32xf32>
    %464 = arith.mulf %463, %459 : vector<8x32xf32>
    %465 = vector.broadcast %462 : vector<1x1xf32> to vector<8x32xf32>
    %466 = arith.subf %465, %464 : vector<8x32xf32>
    %467 = arith.mulf %466, %466 : vector<8x32xf32>
    %468 = vector.shape_cast %467 : vector<8x32xf32> to vector<1x8x32xf32>
    %cst_119 = arith.constant dense<0.000000e+00> : vector<1xf32>
    %469 = vector.multi_reduction <add>, %468, %cst_119 [1, 2] : vector<1x8x32xf32> to vector<1xf32>
    %470 = vector.shape_cast %469 : vector<1xf32> to vector<1x1x1xf32>
    %471 = vector.extract %470[0, 0, 0] : f32 from vector<1x1x1xf32>
    %472 = vector.broadcast %471 : f32 to vector<1x1xf32>
    %473 = arith.addf %357, %472 : vector<1x1xf32>
    %c3_i32 = arith.constant 3 : i32
    %474 = arith.cmpi eq, %0, %c3_i32 : i32
    %475 = arith.extui %474 : i1 to i32
    %c0_i32_120 = arith.constant 0 : i32
    %476 = arith.cmpi ne, %475, %c0_i32_120 : i32
    scf.if %476 {
      %c0_137 = arith.constant 0 : index
      %c0_138 = arith.constant 0 : index
      %518 = vector.load %arg14[%c0_137, %c0_138] : memref<8x32xf32, #tpu.memory_space<vmem>>, vector<8x32xf32>
      tpu.vector_store %arg14[%c0_137, %c0_138], %460 {strides = array<i32>} : memref<8x32xf32, #tpu.memory_space<vmem>>, vector<8x32xf32>,
      %c0_139 = arith.constant 0 : index
      %c0_140 = arith.constant 0 : index
      %519 = vector.load %arg15[%c0_139, %c0_140] : memref<8x1xf32, #tpu.memory_space<vmem>>, vector<8x1xf32>
      tpu.vector_store %arg15[%c0_139, %c0_140], %395 {strides = array<i32>} : memref<8x1xf32, #tpu.memory_space<vmem>>, vector<8x1xf32>,
    } else {
    }
    %c2_i32_121 = arith.constant 2 : i32
    %477 = arith.cmpi eq, %0, %c2_i32_121 : i32
    %478 = arith.extui %477 : i1 to i32
    %c0_i32_122 = arith.constant 0 : i32
    %479 = arith.cmpi ne, %478, %c0_i32_122 : i32
    scf.if %479 {
      %c0_137 = arith.constant 0 : index
      %c0_138 = arith.constant 0 : index
      %518 = vector.load %arg13[%c0_137, %c0_138] : memref<8x32xf32, #tpu.memory_space<vmem>>, vector<8x32xf32>
      tpu.vector_store %arg13[%c0_137, %c0_138], %458 {strides = array<i32>} : memref<8x32xf32, #tpu.memory_space<vmem>>, vector<8x32xf32>,
    } else {
    }
    %c4 = arith.constant 4 : index
    %c0_123 = arith.constant 0 : index
    %480 = vector.load %arg10[%c4, %c0_123] : memref<5x32xf32, #tpu.memory_space<vmem>>, vector<1x32xf32>
    %cst_124 = arith.constant dense<0.000000e+00> : vector<8x32xf32>
    %481 = tpu.matmul %460, %1, %cst_124 {dimension_numbers = #tpu.dot_dimension_numbers<[1], [1], [0], [0], [0, 0, 1, 0], [], []>} : vector<8x32xf32>, vector<32x32xf32>, vector<8x32xf32> -> vector<8x32xf32>
    %482 = vector.broadcast %2 : vector<1x32xf32> to vector<8x32xf32>
    %483 = arith.addf %481, %482 : vector<8x32xf32>
    %484 = math.tanh %483 : vector<8x32xf32>
    %485 = arith.mulf %484, %484 : vector<8x32xf32>
    %cst_125 = arith.constant 1.000000e+00 : f32
    %486 = vector.broadcast %cst_125 : f32 to vector<8x32xf32>
    %487 = arith.subf %486, %485 : vector<8x32xf32>
    %cst_126 = arith.constant dense<0.000000e+00> : vector<8x32xf32>
    %488 = tpu.matmul %484, %4, %cst_126 {dimension_numbers = #tpu.dot_dimension_numbers<[1], [1], [0], [0], [0, 0, 1, 0], [], []>} : vector<8x32xf32>, vector<32x32xf32>, vector<8x32xf32> -> vector<8x32xf32>
    %489 = vector.broadcast %480 : vector<1x32xf32> to vector<8x32xf32>
    %490 = arith.addf %488, %489 : vector<8x32xf32>
    %491 = math.tanh %490 : vector<8x32xf32>
    %492 = arith.mulf %491, %491 : vector<8x32xf32>
    %cst_127 = arith.constant 1.000000e+00 : f32
    %493 = vector.broadcast %cst_127 : f32 to vector<8x32xf32>
    %494 = arith.subf %493, %492 : vector<8x32xf32>
    %495 = vector.broadcast %5 : vector<1x32xf32> to vector<8x32xf32>
    %496 = arith.mulf %491, %495 : vector<8x32xf32>
    %cst_128 = arith.constant dense<0.000000e+00> : vector<8xf32>
    %497 = vector.multi_reduction <add>, %496, %cst_128 [1] : vector<8x32xf32> to vector<8xf32>
    %498 = vector.shape_cast %497 : vector<8xf32> to vector<8x1xf32>
    %499 = vector.broadcast %6 : vector<1x1xf32> to vector<8x1xf32>
    %500 = arith.addf %498, %499 : vector<8x1xf32>
    %501 = math.tanh %500 : vector<8x1xf32>
    %502 = arith.mulf %501, %501 : vector<8x1xf32>
    %cst_129 = arith.constant 1.000000e+00 : f32
    %503 = vector.broadcast %cst_129 : f32 to vector<8x1xf32>
    %504 = arith.subf %503, %502 : vector<8x1xf32>
    %505 = vector.broadcast %5 : vector<1x32xf32> to vector<8x32xf32>
    %506 = arith.mulf %494, %505 : vector<8x32xf32>
    %507 = vector.broadcast %504 : vector<8x1xf32> to vector<8x32xf32>
    %508 = arith.mulf %507, %506 : vector<8x32xf32>
    %cst_130 = arith.constant dense<0.000000e+00> : vector<8x32xf32>
    %509 = tpu.matmul %508, %4, %cst_130 {dimension_numbers = #tpu.dot_dimension_numbers<[1], [0], [0], [1], [0, 0, 1, 1], [], []>} : vector<8x32xf32>, vector<32x32xf32>, vector<8x32xf32> -> vector<8x32xf32>
    %510 = arith.mulf %509, %487 : vector<8x32xf32>
    %cst_131 = arith.constant dense<0.000000e+00> : vector<8x32xf32>
    %511 = tpu.matmul %510, %1, %cst_131 {dimension_numbers = #tpu.dot_dimension_numbers<[1], [0], [0], [1], [0, 0, 1, 1], [], []>} : vector<8x32xf32>, vector<32x32xf32>, vector<8x32xf32> -> vector<8x32xf32>
    %c3_i32_132 = arith.constant 3 : i32
    %512 = arith.cmpi eq, %0, %c3_i32_132 : i32
    %513 = arith.extui %512 : i1 to i32
    %c0_i32_133 = arith.constant 0 : i32
    %514 = arith.cmpi ne, %513, %c0_i32_133 : i32
    scf.if %514 {
      %c0_137 = arith.constant 0 : index
      %c0_138 = arith.constant 0 : index
      %518 = vector.load %arg13[%c0_137, %c0_138] : memref<8x32xf32, #tpu.memory_space<vmem>>, vector<8x32xf32>
      tpu.vector_store %arg13[%c0_137, %c0_138], %511 {strides = array<i32>} : memref<8x32xf32, #tpu.memory_space<vmem>>, vector<8x32xf32>,
    } else {
    }
    %cst_134 = arith.constant 3.906250e-03 : f32
    %515 = vector.broadcast %cst_134 : f32 to vector<1x1xf32>
    %516 = arith.mulf %473, %515 : vector<1x1xf32>
    %c0_135 = arith.constant 0 : index
    %c0_136 = arith.constant 0 : index
    %517 = vector.load %arg17[%c0_135, %c0_136] : memref<1x1xf32, #tpu.memory_space<vmem>>, vector<1x1xf32>
    tpu.vector_store %arg17[%c0_135, %c0_136], %516 {strides = array<i32>} : memref<1x1xf32, #tpu.memory_space<vmem>>, vector<1x1xf32>,
    return
  }
  func.func @transform_0(%arg0: i32, %arg1: memref<1xi32, #tpu.memory_space<smem>>) -> (i32, i32) {
    %c0_i32 = arith.constant 0 : i32
    %c0_i32_0 = arith.constant 0 : i32
    %c0_i32_1 = arith.constant 0 : i32
    return %c0_i32, %c0_i32_0 : i32, i32
  }
  func.func @transform_1(%arg0: i32, %arg1: memref<1xi32, #tpu.memory_space<smem>>) -> (i32, i32) {
    %c0_i32 = arith.constant 0 : i32
    %c0_i32_0 = arith.constant 0 : i32
    %c0_i32_1 = arith.constant 0 : i32
    return %c0_i32, %c0_i32_0 : i32, i32
  }
  func.func @transform_2(%arg0: i32, %arg1: memref<1xi32, #tpu.memory_space<smem>>) -> (i32, i32) {
    %c0_i32 = arith.constant 0 : i32
    %c0_i32_0 = arith.constant 0 : i32
    %c0_i32_1 = arith.constant 0 : i32
    return %c0_i32, %c0_i32_0 : i32, i32
  }
  func.func @transform_3(%arg0: i32, %arg1: memref<1xi32, #tpu.memory_space<smem>>) -> (i32, i32) {
    %c0_i32 = arith.constant 0 : i32
    %c0_i32_0 = arith.constant 0 : i32
    %c0_i32_1 = arith.constant 0 : i32
    return %c0_i32, %c0_i32_0 : i32, i32
  }
  func.func @transform_4(%arg0: i32, %arg1: memref<1xi32, #tpu.memory_space<smem>>) -> (i32, i32) {
    %c0_i32 = arith.constant 0 : i32
    %c0_i32_0 = arith.constant 0 : i32
    %c0_i32_1 = arith.constant 0 : i32
    return %c0_i32, %c0_i32_0 : i32, i32
  }
  func.func @transform_5(%arg0: i32, %arg1: memref<1xi32, #tpu.memory_space<smem>>) -> (i32, i32) {
    %c0_i32 = arith.constant 0 : i32
    %c0_i32_0 = arith.constant 0 : i32
    %c0_i32_1 = arith.constant 0 : i32
    return %c0_i32, %c0_i32_0 : i32, i32
  }
  func.func @transform_6(%arg0: i32, %arg1: memref<1xi32, #tpu.memory_space<smem>>) -> (i32, i32) {
    %c0_i32 = arith.constant 0 : i32
    %c0_i32_0 = arith.constant 0 : i32
    %c0_i32_1 = arith.constant 0 : i32
    return %c0_i32, %c0_i32_0 : i32, i32
  }
  func.func @transform_7(%arg0: i32, %arg1: memref<1xi32, #tpu.memory_space<smem>>) -> (i32, i32) {
    %c0_i32 = arith.constant 0 : i32
    %c0_i32_0 = arith.constant 0 : i32
    %c0_i32_1 = arith.constant 0 : i32
    return %c0_i32, %c0_i32_0 : i32, i32
  }
  func.func @transform_8(%arg0: i32, %arg1: memref<1xi32, #tpu.memory_space<smem>>) -> (i32, i32) {
    %c0_i32 = arith.constant 0 : i32
    %c0_i32_0 = arith.constant 0 : i32
    %c0_i32_1 = arith.constant 0 : i32
    return %c0_i32, %c0_i32_0 : i32, i32
  }
  func.func @transform_9(%arg0: i32, %arg1: memref<1xi32, #tpu.memory_space<smem>>) -> (i32, i32) {
    %c0_i32 = arith.constant 0 : i32
    %c0_i32_0 = arith.constant 0 : i32
    %c0_i32_1 = arith.constant 0 : i32
    return %c0_i32, %c0_i32_0 : i32, i32
  }
  func.func @transform_10(%arg0: i32, %arg1: memref<1xi32, #tpu.memory_space<smem>>) -> (i32, i32) {
    %c0_i32 = arith.constant 0 : i32
    %c0_i32_0 = arith.constant 0 : i32
    %c0_i32_1 = arith.constant 0 : i32
    return %c0_i32, %c0_i32_0 : i32, i32
  }
  func.func @transform_11(%arg0: i32, %arg1: memref<1xi32, #tpu.memory_space<smem>>) -> (i32, i32) {
    %c0_i32 = arith.constant 0 : i32
    %c0_i32_0 = arith.constant 0 : i32
    %c0_i32_1 = arith.constant 0 : i32
    return %c0_i32, %c0_i32_0 : i32, i32
  }
  func.func @transform_12(%arg0: i32, %arg1: memref<1xi32, #tpu.memory_space<smem>>) -> (i32, i32) {
    %c0_i32 = arith.constant 0 : i32
    %c0_i32_0 = arith.constant 0 : i32
    %c0_i32_1 = arith.constant 0 : i32
    return %c0_i32, %c0_i32_0 : i32, i32
  }
  func.func @transform_13(%arg0: i32, %arg1: memref<1xi32, #tpu.memory_space<smem>>) -> (i32, i32) {
    %c0_i32 = arith.constant 0 : i32
    %c0_i32_0 = arith.constant 0 : i32
    %c0_i32_1 = arith.constant 0 : i32
    return %c0_i32, %c0_i32_0 : i32, i32
  }
  func.func @transform_14(%arg0: i32, %arg1: memref<1xi32, #tpu.memory_space<smem>>) -> (i32, i32) {
    %c0_i32 = arith.constant 0 : i32
    %c0_i32_0 = arith.constant 0 : i32
    %c0_i32_1 = arith.constant 0 : i32
    return %c0_i32, %c0_i32_0 : i32, i32
  }
  func.func @transform_15(%arg0: i32, %arg1: memref<1xi32, #tpu.memory_space<smem>>) -> (i32, i32) {
    %c0_i32 = arith.constant 0 : i32
    %c0_i32_0 = arith.constant 0 : i32
    %c0_i32_1 = arith.constant 0 : i32
    return %c0_i32, %c0_i32_0 : i32, i32
  }
}

</mosaic_0001>

<bundles_post_ra>
// kernel: wavepde_forward_core.1
= control target key start
LH: loop header
LB: loop body
LE: loop exit
PB: predicated region body
PF: predicated region fallthrough
CT: control target
= control target key end

     0   :  { %s2052_s0 = inlined_call_operand.<no memory space> [shape: s32[1], index: 0, kind: input, shape index: {}]   ;;  %s2053_s1 = inlined_call_operand.vmem [shape: f32[8,32], index: 1, kind: input, shape index: {}]   ;;  %s2054_s2 = inlined_call_operand.vmem [shape: f32[32,32], index: 2, kind: input, shape index: {}]   ;;  %s2055_s3 = inlined_call_operand.vmem [shape: f32[1,32], index: 3, kind: input, shape index: {}]   ;;  %s2056_s4 = inlined_call_operand.vmem [shape: f32[1,32], index: 4, kind: input, shape index: {}]   ;;  %s2057_s5 = inlined_call_operand.vmem [shape: f32[32,32], index: 5, kind: input, shape index: {}]   ;;  %s2058_s6 = inlined_call_operand.vmem [shape: f32[1,32], index: 6, kind: input, shape index: {}]   ;;  %s2059_s7 = inlined_call_operand.<no memory space> [shape: f32[1,1], index: 7, kind: input, shape index: {}]   ;;  %s2060_s9 = inlined_call_operand.vmem [shape: f32[5,32], index: 9, kind: input, shape index: {}]   ;;  %s2061_s10 = inlined_call_operand.vmem [shape: f32[5,32], index: 10, kind: input, shape index: {}]   ;;  %s2062_s11 = inlined_call_operand.vmem [shape: f32[5,32], index: 11, kind: input, shape index: {}]   ;;  %s2063_s12 = inlined_call_operand.hbm [shape: f32[8,32], index: 12, kind: output, shape index: {0}]   ;;  %s2064_s13 = inlined_call_operand.hbm [shape: f32[8,32], index: 13, kind: output, shape index: {1}]   ;;  %s2065_s14 = inlined_call_operand.vmem [shape: f32[8,1], index: 14, kind: output, shape index: {2}]   ;;  %s2066_s15 = inlined_call_operand.hbm [shape: f32[1,1], index: 15, kind: output, shape index: {3}]   ;;  %s2067_s16 = inlined_call_operand.hbm [shape: f32[1,1], index: 16, kind: output, shape index: {4}]   ;;  %s2068_s8 = inlined_call_operand.<no memory space> [shape: f32[1,1], index: 8, kind: input, shape index: {}]  }
   0x1   :  { %2073 = sst [smem:[#allocation16_spill]] %s2052_s0  ;;  %v23_v0 = vstv %s2059_s7  ;;  %v25_v1 = vstv %s2068_s8 }
   0x2   :  { %24 = vst [vmem:[#allocation4] sm:$0x1] %v23_v0 }
   0x3   :  { %26 = vst [vmem:[#allocation5] sm:$0x1] %v25_v1 }
   0x4   :  { %27 = vsyncpa [#allocation7], 0 }
   0x5   :  { %28 = vsyncpa [#allocation9], 0 }
   0x6   :  { %29 = vsyncpa [#allocation12], 0  ;;  %v1555_v2 = vld [vmem:[%s2054_s2 + $0x18] sm:$0xff]  ;;  %vm71_vm0 = vcmask 261120   ;;  %v1563_v3 = vld [vmem:[%s2054_s2 + $0x10] sm:$0xff]  ;;  %v1455_v49 = vmov 0  }
   0x7   :  { %1198 = vmatpush.xpose.msk.msra.mxu0 %vm71_vm0, %v1555_v2  ;;  %275 = vmatpush.msra.mxu3 %v1555_v2  ;;  %v1568_v4 = vld [vmem:[%s2057_s5 + $0x18] sm:$0xff]  ;;  %v1575_v5 = vld [vmem:[%s2057_s5 + $0x10] sm:$0xff]  ;;  %v1584_v6 = vld [vmem:[%s2054_s2 + $0x8] sm:$0xff]  ;;  %vm287_vm1 = vcmask 7168   ;;  %vm341_vm3 = vcmask 0   ;;  %s2074_s19 = sld [smem:[#allocation16_spill]] }
   0x8   :  { %1203 = vmatpush.xpose.msk.msra.mxu1 %vm71_vm0, %v1568_v4  ;;  %242 = vmatpush.msra.mxu2 %v1568_v4  ;;  %v1591_v7 = vld [vmem:[%s2054_s2] sm:$0xff]  ;;  %v1610_v9 = vld [vmem:[%s2057_s5 + $0x8] sm:$0xff] }
   0x9   :  { %276 = vmatpush.msra.mxu3 %v1563_v3  ;;  %v1603_v8 = vld [vmem:[%s2053_s1] sm:$0xff]  ;;  %1294 = vset.pattern.permute.xlu1 %v1455_v49 }
   0xa   :  { %243 = vmatpush.msra.mxu2 %v1575_v5  ;;  %v1618_v10 = vld [vmem:[%s2057_s5] sm:$0xff]  ;;  %1295 = vset.pattern.permute.xlu0 %v1455_v49 }
   0xb   :  { %1199 = vmatpush.xpose.msk.msra.mxu0 %vm71_vm0, %v1563_v3  ;;  %277 = vmatpush.msra.mxu3 %v1584_v6  ;;  %v1626_v11 = vld [vmem:[%s2055_s3] ss:$0 sm:$0xff] }
   0xc   :  { %1204 = vmatpush.xpose.msk.msra.mxu1 %vm71_vm0, %v1575_v5  ;;  %244 = vmatpush.msra.mxu2 %v1610_v9  ;;  %v1633_v16 = vld [vmem:[%s2056_s4] ss:$0 sm:$0xff] }
   0xd   :  { %278 = vmatpush.msra.mxu3 %v1591_v7  ;;  %v1298_v21 = vld [vmem:[%s2060_s9] ss:$0 sm:$0xff]  ;;  %p1213_p0 = scmp.ne.s32.totalorder %s2074_s19, 0 }
   0xe   :  { %245 = vmatpush.msra.mxu2 %v1618_v10  ;;  %v1648_v24 = vld [vmem:[%s2058_s6] ss:$0 sm:$0xff] }
   0xf   :  { %1200 = vmatpush.xpose.msk.msra.mxu0 %vm71_vm0, %v1584_v6  ;;  %v1300_v28 = vld [vmem:[%s2061_s10] ss:$0 sm:$0xff] }
  0x10   :  { %1205 = vmatpush.xpose.msk.msra.mxu1 %vm71_vm0, %v1610_v9  ;;  %v1301_v35 = vld [vmem:[%s2062_s11] ss:$0 sm:$0xff] }
  0x11   :  { %v1668_v50 = vld [vmem:[#allocation4] ss:$0 sm:$0xff] }
  0x13   :  { %1201 = vmatpush.xpose.msk.msra.mxu0 %vm71_vm0, %v1591_v7 }
  0x14   :  { %1206 = vmatpush.xpose.msk.msra.mxu1 %vm71_vm0, %v1618_v10 }
  0x16   :  { %1202 = vmatmul.msk.f32.vlgmr.msra.gmra.mxu0 %vm71_vm0, %v1603_v8 }
  0x93   :  { %v104_v12 = vpop.f32.mrf.mxu0 }
  0x94   :  { %v105_v13 = vadd.f32 %v1626_v11, %v104_v12 }
  0x96   :  { %1304 = vtanh.f32 %v105_v13 }
  0x9c   :  { %v1305_v14 = vpop.eup %1304 }
  0x9d   :  { %1207 = vmatmul.msk.f32.vlgmr.msra.gmra.mxu1 %vm71_vm0, %v1305_v14  ;;  %v108_v15 = vmul.f32 %v1305_v14, %v1305_v14  ;;  %v116_v19 = vmul.f32 -2.0, %v1305_v14 }
  0x9f   :  { %v1635_v17 = vsub.f32 1.0, %v108_v15 }
  0xa1   :  { %v115_v18 = vmul.f32 %v1633_v16, %v1635_v17 }
  0xa3   :  { %v1639_v20 = vmul.f32 %v116_v19, %v115_v18 }
  0xa5   :  { %1208 = vmatmul.msk.f32.gmra.mxu1 %vm71_vm0, %v115_v18 }
 0x11a   :  { %v153_v22 = vpop.f32.mrf.mxu1 }
 0x11b   :  { %v160_v23 = vadd.f32 %v1298_v21, %v153_v22 }
 0x11d   :  { %1306 = vtanh.f32 %v160_v23 }
 0x122   :  { %v156_v31 = vpop.f32.mrf.mxu1 }
 0x123   :  { %v1307_v25 = vpop.eup %1306 }
 0x124   :  { %v162_v26 = vmul.f32 %v1307_v25, %v1307_v25  ;;  %v167_v27 = vmul.f32 %v1307_v25, %v1648_v24  ;;  %v186_v33 = vmul.f32 -2.0, %v1307_v25 }
 0x126   :  { %v163_v29 = vsub.f32 1.0, %v162_v26  ;;  %v168_v30 = vsel %vm71_vm0, %v167_v27, 0.0 }
 0x127   :  { %169 = vadd.xlane.f32.xlu0 %v168_v30  ;;  %v1303_v30 = vld [vmem:[#allocation5] ss:$0 sm:$0xff] }
 0x128   :  { %v185_v32 = vmul.f32 %v163_v29, %v156_v31  ;;  %v189_v34 = vmul.f32 %v1300_v28, %v163_v29  ;;  %v178_v36 = vmul.f32 %v1648_v24, %v163_v29  ;;  %v193_v43 = vmul.f32 %v1301_v35, %v163_v29 }
 0x12a   :  { %v187_v37 = vmul.f32 %v186_v33, %v185_v32  ;;  %v199_v38 = vmul.f32 %v1648_v24, %v189_v34  ;;  %v190_v39 = vmul.f32 %v189_v34, %v186_v33  ;;  %v195_v40 = vmul.f32 %v1648_v24, %v185_v32 }
 0x12c   :  { %v200_v41 = vsel %vm71_vm0, %v199_v38, 0.0  ;;  %v191_v42 = vmul.f32 %v1300_v28, %v190_v39  ;;  %v221_v44 = vmul.f32 %v1648_v24, %v187_v37  ;;  %v196_v45 = vsel %vm71_vm0, %v195_v40, 0.0 }
 0x12d   :  { %201 = vadd.xlane.f32.xlu2 %v200_v41 }
 0x12e   :  { %v194_v46 = vadd.f32 %v193_v43, %v191_v42 }
 0x12f   :  { %197 = vadd.xlane.f32.xlu0 %v196_v45 }
 0x130   :  { %v203_v47 = vmul.f32 %v1648_v24, %v194_v46 }
 0x132   :  { %v204_v48 = vsel %vm71_vm0, %v203_v47, 0.0 }
 0x135   :  { %205 = vadd.xlane.f32.xlu2 %v204_v48 }
 0x143   :  { %298 = vperm.xlu0 %1295, %v1303_v30  }
 0x19a   :  { %v170_v51 = vpop.xlane.xlu0 %169 }
 0x19b   :  { %v174_v52 = vadd.f32 %v1668_v50, %v170_v51 }
 0x19d   :  { %1308 = vtanh.f32 %v174_v52 }
 0x1a0   :  { %v202_v53 = vpop.xlane.xlu2 %201 }
 0x1a2   :  { %v198_v59 = vpop.xlane.xlu0 %197 }
 0x1a3   :  { %v1671_v54 = vpop.eup %1308 }
 0x1a4   :  { %v176_v55 = vmul.f32 %v1671_v54, %v1671_v54  ;;  %v208_v57 = vmul.f32 -2.0, %v1671_v54 }
 0x1a6   :  { %v177_v56 = vsub.f32 1.0, %v176_v55 }
 0x1a8   :  { %v210_v58 = vmul.f32 %v202_v53, %v177_v56  ;;  %181 = vperm.xlu1 %1294, %v177_v56   ;;  %v206_v60 = vpop.xlane.xlu2 %205  ;;  %v207_v62 = vmul.f32 %v198_v59, %v177_v56 }
 0x1a9   :  { %v213_v0 = vmul.f32 %v206_v60, %v177_v56 }
 0x1aa   :  { %v211_v61 = vmul.f32 %v210_v58, %v208_v57  ;;  %v209_v1 = vmul.f32 %v208_v57, %v207_v62  ;;  %v1456_v62 = vmov 256.0  }
 0x1ab   :  { %1310 = vrcp.f32 %v1456_v62 }
 0x1ac   :  { %v212_v63 = vmul.f32 %v211_v61, %v202_v53 }
 0x1ae   :  { %v214_v12 = vadd.f32 %v213_v0, %v212_v63 }
 0x1b0   :  { %v288_v13 = vsel %vm287_vm1, %v214_v12, 0.0  ;;  %217 = vperm.xlu1 %1294, %v209_v1  }
 0x1b1   :  { %v289_v14 = vrot.slane %v288_v13, 4  ;;  %v1311_v63 = vpop.eup %1310 }
 0x1b2   :  { %v334_v0 = vmul.f32 256.0, %v1311_v63  ;;  %vm338_vm2 = vweird.f32 %v1311_v63 }
 0x1b3   :  { %v290_v15 = vadd.f32 %v289_v14, %v288_v13 }
 0x1b4   :  { %v335_v1 = vsub.f32 1.0, %v334_v0 }
 0x1b5   :  { %v291_v18 = vrot.slane %v290_v15, 2  ;;  %v1688_v41 = vpop.permute.xlu0 %298 }
 0x1b6   :  { %v336_v12 = vmul.f32 %v1311_v63, %v335_v1 }
 0x1b7   :  { %v292_v19 = vadd.f32 %v291_v18, %v290_v15 }
 0x1b8   :  { %v337_v13 = vadd.f32 %v1311_v63, %v336_v12 }
 0x1b9   :  { %v293_v21 = vrot.slane %v292_v19, 1 }
 0x1ba   :  { %v339_v14 = vsel %vm338_vm2, %v1311_v63, %v337_v13 }
 0x1bb   :  { %v294_v22 = vadd.f32 %v293_v21, %v292_v19 }
 0x1bd   :  { %304 = vperm.xlu1 %1294, %v294_v22  }
 0x21a   :  { %v182_v23 = vpop.permute.xlu1 %181 }
 0x21b   :  { %v184_v25 = vmul.f32 %v182_v23, %v178_v36  ;;  %v222_v27 = vmul.f32 %v221_v44, %v182_v23 }
 0x21d   :  { %1209 = vmatmul.msk.f32.vlgmr.msra.gmra.mxu2 %vm71_vm0, %v184_v25 }
 0x222   :  { %v218_v26 = vpop.permute.xlu1 %217 }
 0x223   :  { %v220_v28 = vmul.f32 %v218_v26, %v178_v36 }
 0x225   :  { %v223_v29 = vadd.f32 %v222_v27, %v220_v28 }
 0x227   :  { %1210 = vmatmul.msk.f32.gmra.mxu2 %vm71_vm0, %v223_v29 }
 0x22f   :  { %v305_v44 = vpop.permute.xlu1 %304 }
 0x2a0   :  { %v247_v31 = vpop.f32.mrf.mxu2 }
 0x2a1   :  { %v253_v32 = vmul.f32 %v247_v31, %v1635_v17  ;;  %v255_v34 = vmul.f32 %v247_v31, %v1639_v20 }
 0x2a3   :  { %1211 = vmatmul.msk.f32.vlgmr.msra.gmra.mxu3 %vm71_vm0, %v253_v32 }
 0x2aa   :  { %v250_v33 = vpop.f32.mrf.mxu2 }
 0x2ab   :  { %v254_v35 = vmul.f32 %v250_v33, %v1635_v17 }
 0x2ad   :  { %v256_v37 = vadd.f32 %v255_v34, %v254_v35 }
 0x2af   :  { %1212 = vmatmul.msk.f32.gmra.mxu3 %vm71_vm0, %v256_v37 }
 0x326   :  { %v280_v38 = vpop.f32.mrf.mxu3 }
 0x327   :  { %v1685_v36 = vadd.f32 %v280_v38, %v1603_v8  ;;  %v321_v39 = vmul.f32 %v280_v38, %v280_v38 }
 0x329   :  { %v322_v40 = vsel %vm71_vm0, %v321_v39, 0.0 }
 0x32a   :  { %323 = vadd.xlane.f32.xlu1 %v322_v40 }
 0x332   :  { %v283_v42 = vpop.f32.mrf.mxu3 }
 0x333   :  { %v301_v43 = vmul.f32 %v1688_v41, %v283_v42 }
 0x335   :  { %v307_v20 = vsub.f32 %v305_v44, %v301_v43 }
 0x337   :  { %v308_v45 = vmul.f32 %v307_v20, %v307_v20 }
 0x339   :  { %v309_v17 = vsel %vm71_vm0, %v308_v45, 0.0 }
 0x33a   :  { %310 = vadd.xlane.f32.xlu2 %v309_v17 }
 0x39d   :  { %v324_v46 = vpop.xlane.xlu1 %323 }
 0x39e   :  { %v325_v47 = vrot.slane %v324_v46, 4 }
 0x3a0   :  { %v326_v48 = vadd.f32 %v325_v47, %v324_v46 }
 0x3a2   :  { %v327_v8 = vrot.slane %v326_v48, 2 }
 0x3a4   :  { %v328_v55 = vadd.f32 %v327_v8, %v326_v48 }
 0x3a6   :  { %v329_v58 = vrot.slane %v328_v55, 1 }
 0x3a8   :  { %v330_v61 = vadd.f32 %v329_v58, %v328_v55 }
 0x3ad   :  { %v311_v51 = vpop.xlane.xlu2 %310 }
 0x3ae   :  { %v312_v52 = vrot.slane %v311_v51, 4 }
 0x3b0   :  { %v313_v53 = vadd.f32 %v312_v52, %v311_v51 }
 0x3b2   :  { %v314_v56 = vrot.slane %v313_v53, 2 }
 0x3b4   :  { %v315_v57 = vadd.f32 %v314_v56, %v313_v53 }
 0x3b6   :  { %v316_v59 = vrot.slane %v315_v57, 1 }
 0x3b8   :  { %v317_v60 = vadd.f32 %v316_v59, %v315_v57 }
 0x3ba   :  { %1278 = vpush %v317_v60 }
 0x3bb   :  { %1280 = vpush %v330_v61 }
 0x3eb   :  { %s1692_s6 = spop %1278 }
 0x3ec   :  { %v319_v15 = vstv %s1692_s6  ;;  %s1281_s0 = spop %1280  ;;  %346 = sbr.rel (%p1213_p0) target bundleno = 1011 (0x3f3), region = 49 }
 0x3ed   :  { %v332_v18 = vstv %s1281_s0 }
 0x3ee   :  { %v340_v19 = vmul.f32 %v339_v14, %v332_v18 }
 0x3f0   :  { %342 = vst.msk [vmem:[#allocation10] sm:$0x1] %vm341_vm3, %v340_v19 }
 0x3f1   :  { %347 = vst.msk [vmem:[#allocation8] sm:$0xff] %vm71_vm0, %v1685_v36 }
 0x3f2   :  { %348 = vst.msk [vmem:[%s2065_s14] sm:$0xff] %vm287_vm1, %v1671_v54 }
 0x3f3 PF:  { %1214 = vmatpush.xpose.msk.msrb.mxu2 %vm71_vm0, %v1555_v2  ;;  %1219 = vmatpush.xpose.msk.msrb.mxu3 %vm71_vm0, %v1568_v4  ;;  %v1314_v29 = vld [vmem:[%s2060_s9 + $0x1] ss:$0 sm:$0xff]  ;;  %s2075_s4 = sld [smem:[#allocation16_spill]] }
 0x3f4   :  { %1312 = vset.pattern.permute.xlu1 %v1455_v49  ;;  %1313 = vset.pattern.permute.xlu0 %v1455_v49  ;;  %v1315_v35 = vld [vmem:[%s2061_s10 + $0x1] ss:$0 sm:$0xff] }
 0x3f5   :  { %487 = vmatpush.msrb.mxu0 %v1568_v4  ;;  %520 = vmatpush.msrb.mxu1 %v1555_v2  ;;  %v1316_v44 = vld [vmem:[%s2062_s11 + $0x1] ss:$0 sm:$0xff] }
 0x3f7   :  { %1215 = vmatpush.xpose.msk.msrb.mxu2 %vm71_vm0, %v1563_v3  ;;  %1220 = vmatpush.xpose.msk.msrb.mxu3 %vm71_vm0, %v1575_v5 }
 0x3f8   :  { %488 = vmatpush.msrb.mxu0 %v1575_v5  ;;  %521 = vmatpush.msrb.mxu1 %v1563_v3 }
 0x3f9   :  { %p1229_p1 = scmp.ne.s32.totalorder %s2075_s4, 1 }
 0x3fa   :  { %489 = vmatpush.msrb.mxu0 %v1610_v9  ;;  %522 = vmatpush.msrb.mxu1 %v1584_v6 }
 0x3fb   :  { %1216 = vmatpush.xpose.msk.msrb.mxu2 %vm71_vm0, %v1584_v6  ;;  %1221 = vmatpush.xpose.msk.msrb.mxu3 %vm71_vm0, %v1610_v9 }
 0x3fc   :  { %490 = vmatpush.msrb.mxu0 %v1618_v10  ;;  %523 = vmatpush.msrb.mxu1 %v1591_v7 }
 0x3ff   :  { %1217 = vmatpush.xpose.msk.msrb.mxu2 %vm71_vm0, %v1591_v7  ;;  %1222 = vmatpush.xpose.msk.msrb.mxu3 %vm71_vm0, %v1618_v10 }
 0x402   :  { %1218 = vmatmul.msk.f32.vlgmr.msrb.gmra.mxu2 %vm71_vm0, %v1685_v36 }
 0x485   :  { %v370_v54 = vpop.f32.mrf.mxu2 }
 0x486   :  { %v371_v21 = vadd.f32 %v1626_v11, %v370_v54 }
 0x488   :  { %1317 = vtanh.f32 %v371_v21 }
 0x48e   :  { %v1318_v22 = vpop.eup %1317 }
 0x48f   :  { %1223 = vmatmul.msk.f32.vlgmr.msrb.gmra.mxu3 %vm71_vm0, %v1318_v22  ;;  %v374_v23 = vmul.f32 %v1318_v22, %v1318_v22  ;;  %v379_v27 = vmul.f32 -2.0, %v1318_v22 }
 0x491   :  { %v1740_v25 = vsub.f32 1.0, %v374_v23 }
 0x493   :  { %v378_v26 = vmul.f32 %v1633_v16, %v1740_v25 }
 0x495   :  { %v1744_v28 = vmul.f32 %v379_v27, %v378_v26 }
 0x497   :  { %1224 = vmatmul.msk.f32.gmra.mxu3 %vm71_vm0, %v378_v26 }
 0x512   :  { %v404_v30 = vpop.f32.mrf.mxu3 }
 0x513   :  { %v411_v31 = vadd.f32 %v1314_v29, %v404_v30 }
 0x515   :  { %1319 = vtanh.f32 %v411_v31 }
 0x51a   :  { %v407_v39 = vpop.f32.mrf.mxu3 }
 0x51b   :  { %v1320_v32 = vpop.eup %1319 }
 0x51c   :  { %v413_v33 = vmul.f32 %v1320_v32, %v1320_v32  ;;  %v415_v34 = vmul.f32 %v1320_v32, %v1648_v24  ;;  %v431_v42 = vmul.f32 -2.0, %v1320_v32 }
 0x51e   :  { %v414_v37 = vsub.f32 1.0, %v413_v33  ;;  %v416_v38 = vsel %vm71_vm0, %v415_v34, 0.0 }
 0x51f   :  { %417 = vadd.xlane.f32.xlu0 %v416_v38 }
 0x520   :  { %v430_v40 = vmul.f32 %v414_v37, %v407_v39  ;;  %v434_v43 = vmul.f32 %v1315_v35, %v414_v37  ;;  %v438_v8 = vmul.f32 %v1316_v44, %v414_v37  ;;  %v423_v31 = vmul.f32 %v1648_v24, %v414_v37 }
 0x522   :  { %v432_v20 = vmul.f32 %v431_v42, %v430_v40  ;;  %v444_v45 = vmul.f32 %v1648_v24, %v434_v43  ;;  %v435_v17 = vmul.f32 %v434_v43, %v431_v42  ;;  %v440_v46 = vmul.f32 %v1648_v24, %v430_v40 }
 0x524   :  { %v445_v47 = vsel %vm71_vm0, %v444_v45, 0.0  ;;  %v436_v48 = vmul.f32 %v1315_v35, %v435_v17  ;;  %v441_v51 = vsel %vm71_vm0, %v440_v46, 0.0  ;;  %v466_v34 = vmul.f32 %v1648_v24, %v432_v20 }
 0x525   :  { %446 = vadd.xlane.f32.xlu2 %v445_v47 }
 0x526   :  { %v439_v52 = vadd.f32 %v438_v8, %v436_v48 }
 0x527   :  { %442 = vadd.xlane.f32.xlu0 %v441_v51 }
 0x528   :  { %v448_v53 = vmul.f32 %v1648_v24, %v439_v52 }
 0x52a   :  { %v449_v55 = vsel %vm71_vm0, %v448_v53, 0.0 }
 0x52d   :  { %450 = vadd.xlane.f32.xlu2 %v449_v55 }
 0x592   :  { %v418_v56 = vpop.xlane.xlu0 %417 }
 0x593   :  { %v419_v57 = vadd.f32 %v1668_v50, %v418_v56 }
 0x595   :  { %1321 = vtanh.f32 %v419_v57 }
 0x598   :  { %v447_v58 = vpop.xlane.xlu2 %446 }
 0x59a   :  { %v443_v0 = vpop.xlane.xlu0 %442 }
 0x59b   :  { %v1765_v59 = vpop.eup %1321 }
 0x59c   :  { %v421_v60 = vmul.f32 %v1765_v59, %v1765_v59  ;;  %v453_v62 = vmul.f32 -2.0, %v1765_v59 }
 0x59e   :  { %v422_v61 = vsub.f32 1.0, %v421_v60 }
 0x5a0   :  { %v455_v63 = vmul.f32 %v447_v58, %v422_v61  ;;  %426 = vperm.xlu1 %1312, %v422_v61   ;;  %v451_v1 = vpop.xlane.xlu2 %450  ;;  %v452_v13 = vmul.f32 %v443_v0, %v422_v61 }
 0x5a1   :  { %v458_v18 = vmul.f32 %v451_v1, %v422_v61 }
 0x5a2   :  { %v456_v12 = vmul.f32 %v455_v63, %v453_v62  ;;  %v454_v19 = vmul.f32 %v453_v62, %v452_v13 }
 0x5a4   :  { %v457_v14 = vmul.f32 %v456_v12, %v447_v58 }
 0x5a6   :  { %v459_v54 = vadd.f32 %v458_v18, %v457_v14 }
 0x5a8   :  { %v532_v21 = vsel %vm287_vm1, %v459_v54, 0.0  ;;  %462 = vperm.xlu1 %1312, %v454_v19  }
 0x5a9   :  { %v533_v22 = vrot.slane %v532_v21, 4 }
 0x5ab   :  { %v534_v23 = vadd.f32 %v533_v22, %v532_v21 }
 0x5ad   :  { %v535_v26 = vrot.slane %v534_v23, 2 }
 0x5af   :  { %v536_v27 = vadd.f32 %v535_v26, %v534_v23 }
 0x5b1   :  { %v537_v29 = vrot.slane %v536_v27, 1 }
 0x5b3   :  { %v538_v30 = vadd.f32 %v537_v29, %v536_v27 }
 0x5b5   :  { %542 = vperm.xlu0 %1313, %v538_v30  }
 0x612   :  { %v427_v32 = vpop.permute.xlu1 %426 }
 0x613   :  { %v429_v33 = vmul.f32 %v427_v32, %v423_v31  ;;  %v467_v38 = vmul.f32 %v466_v34, %v427_v32 }
 0x615   :  { %1225 = vmatmul.msk.f32.vlgmr.msrb.gmra.mxu0 %vm71_vm0, %v429_v33 }
 0x61a   :  { %v463_v35 = vpop.permute.xlu1 %462 }
 0x61b   :  { %v465_v39 = vmul.f32 %v463_v35, %v423_v31 }
 0x61d   :  { %v468_v40 = vadd.f32 %v467_v38, %v465_v39 }
 0x61f   :  { %1226 = vmatmul.msk.f32.gmra.mxu0 %vm71_vm0, %v468_v40 }
 0x627   :  { %v543_v8 = vpop.permute.xlu0 %542 }
 0x692   :  { %v492_v42 = vpop.f32.mrf.mxu0 }
 0x693   :  { %v498_v43 = vmul.f32 %v492_v42, %v1740_v25  ;;  %v500_v37 = vmul.f32 %v492_v42, %v1744_v28 }
 0x695   :  { %1227 = vmatmul.msk.f32.vlgmr.msrb.gmra.mxu1 %vm71_vm0, %v498_v43 }
 0x69c   :  { %v495_v44 = vpop.f32.mrf.mxu0 }
 0x69d   :  { %v499_v45 = vmul.f32 %v495_v44, %v1740_v25 }
 0x69f   :  { %v501_v17 = vadd.f32 %v500_v37, %v499_v45 }
 0x6a1   :  { %1228 = vmatmul.msk.f32.gmra.mxu1 %vm71_vm0, %v501_v17 }
 0x712   :  { %v525_v20 = vpop.f32.mrf.mxu1 }
 0x713   :  { %v1781_v46 = vadd.f32 %v525_v20, %v1685_v36 }
 0x71e   :  { %v528_v47 = vpop.f32.mrf.mxu1 }
 0x71f   :  { %v539_v48 = vmul.f32 %v528_v47, %v1688_v41 }
 0x721   :  { %v545_v51 = vsub.f32 %v543_v8, %v539_v48 }
 0x723   :  { %v546_v52 = vmul.f32 %v545_v51, %v545_v51 }
 0x725   :  { %v547_v53 = vsel %vm71_vm0, %v546_v52, 0.0 }
 0x726   :  { %548 = vadd.xlane.f32.xlu1 %v547_v53 }
 0x799   :  { %v549_v28 = vpop.xlane.xlu1 %548 }
 0x79a   :  { %v550_v55 = vrot.slane %v549_v28, 4 }
 0x79c   :  { %v551_v25 = vadd.f32 %v550_v55, %v549_v28 }
 0x79e   :  { %v552_v56 = vrot.slane %v551_v25, 2 }
 0x7a0   :  { %v553_v57 = vadd.f32 %v552_v56, %v551_v25 }
 0x7a2   :  { %v554_v58 = vrot.slane %v553_v57, 1 }
 0x7a4   :  { %v555_v60 = vadd.f32 %v554_v58, %v553_v57 }
 0x7a6   :  { %1282 = vpush %v555_v60 }
 0x7d5   :  { %562 = sbr.rel (%p1229_p1) target bundleno = 2012 (0x7dc), region = 53 }
 0x7d7   :  { %s1283_s3 = spop %1282 }
 0x7d8   :  { %v557_v36 = vstv %s1283_s3 }
 0x7d9   :  { %v1787_v61 = vadd.f32 %v557_v36, %v319_v15 }
 0x7da   :  { %563 = vst.msk [vmem:[#allocation8] sm:$0xff] %vm71_vm0, %v1781_v46 }
 0x7db   :  { %564 = vst.msk [vmem:[%s2065_s14] sm:$0xff] %vm287_vm1, %v1765_v59 }
 0x7dc PF:  { %567 = sbr.rel (%p1213_p0) target bundleno = 2018 (0x7e2), region = 57 }
 0x7e1   :  { %568 = vst.msk [vmem:[#allocation6] sm:$0xff] %vm71_vm0, %v525_v20 }
 0x7e2 PF:  { %1231 = vmatpush.xpose.msk.msra.mxu0 %vm71_vm0, %v1555_v2  ;;  %1236 = vmatpush.xpose.msk.msra.mxu2 %vm71_vm0, %v1568_v4  ;;  %v1325_v14 = vld [vmem:[%s2060_s9 + $0x2] ss:$0 sm:$0xff]  ;;  %s2077_s25 = sld [smem:[#allocation16_spill]] }
 0x7e3   :  { %1323 = vset.pattern.permute.xlu1 %v1455_v49  ;;  %1324 = vset.pattern.permute.xlu0 %v1455_v49  ;;  %v1326_v23 = vld [vmem:[%s2061_s10 + $0x2] ss:$0 sm:$0xff] }
 0x7e4   :  { %707 = vmatpush.msra.mxu3 %v1568_v4  ;;  %v1327_v33 = vld [vmem:[%s2062_s11 + $0x2] ss:$0 sm:$0xff] }
 0x7e6   :  { %1232 = vmatpush.xpose.msk.msra.mxu0 %vm71_vm0, %v1563_v3  ;;  %1237 = vmatpush.xpose.msk.msra.mxu2 %vm71_vm0, %v1575_v5 }
 0x7e7   :  { %708 = vmatpush.msra.mxu3 %v1575_v5 }
 0x7e8   :  { %p1246_p2 = scmp.ne.s32.totalorder %s2077_s25, 2 }
 0x7e9   :  { %709 = vmatpush.msra.mxu3 %v1610_v9 }
 0x7ea   :  { %1233 = vmatpush.xpose.msk.msra.mxu0 %vm71_vm0, %v1584_v6  ;;  %1238 = vmatpush.xpose.msk.msra.mxu2 %vm71_vm0, %v1610_v9 }
 0x7eb   :  { %710 = vmatpush.msra.mxu3 %v1618_v10 }
 0x7ee   :  { %1234 = vmatpush.xpose.msk.msra.mxu0 %vm71_vm0, %v1591_v7  ;;  %1239 = vmatpush.xpose.msk.msra.mxu2 %vm71_vm0, %v1618_v10 }
 0x7f1   :  { %1235 = vmatmul.msk.f32.vlgmr.msra.gmra.mxu0 %vm71_vm0, %v1781_v46 }
 0x7f2   :  { %740 = vmatpush.msrb.mxu0 %v1555_v2 }
 0x7f4   :  { %741 = vmatpush.msrb.mxu0 %v1563_v3 }
 0x7f6   :  { %742 = vmatpush.msrb.mxu0 %v1584_v6 }
 0x7f8   :  { %743 = vmatpush.msrb.mxu0 %v1591_v7 }
 0x86e   :  { %v590_v15 = vpop.f32.mrf.mxu0 }
 0x86f   :  { %v591_v59 = vadd.f32 %v1626_v11, %v590_v15 }
 0x871   :  { %1328 = vtanh.f32 %v591_v59 }
 0x877   :  { %v1329_v62 = vpop.eup %1328 }
 0x878   :  { %1240 = vmatmul.msk.f32.vlgmr.msra.gmra.mxu2 %vm71_vm0, %v1329_v62  ;;  %v594_v63 = vmul.f32 %v1329_v62, %v1329_v62  ;;  %v599_v12 = vmul.f32 -2.0, %v1329_v62 }
 0x87a   :  { %v1838_v0 = vsub.f32 1.0, %v594_v63 }
 0x87c   :  { %v598_v1 = vmul.f32 %v1633_v16, %v1838_v0 }
 0x87e   :  { %v1842_v13 = vmul.f32 %v599_v12, %v598_v1 }
 0x880   :  { %1241 = vmatmul.msk.f32.gmra.mxu2 %vm71_vm0, %v598_v1 }
 0x8fb   :  { %v624_v18 = vpop.f32.mrf.mxu2 }
 0x8fc   :  { %v631_v19 = vadd.f32 %v1325_v14, %v624_v18 }
 0x8fe   :  { %1330 = vtanh.f32 %v631_v19 }
 0x903   :  { %v627_v29 = vpop.f32.mrf.mxu2 }
 0x904   :  { %v1331_v54 = vpop.eup %1330 }
 0x905   :  { %v633_v21 = vmul.f32 %v1331_v54, %v1331_v54  ;;  %v635_v22 = vmul.f32 %v1331_v54, %v1648_v24  ;;  %v651_v31 = vmul.f32 -2.0, %v1331_v54 }
 0x907   :  { %v634_v26 = vsub.f32 1.0, %v633_v21  ;;  %v636_v27 = vsel %vm71_vm0, %v635_v22, 0.0 }
 0x908   :  { %637 = vadd.xlane.f32.xlu0 %v636_v27 }
 0x909   :  { %v650_v30 = vmul.f32 %v634_v26, %v627_v29  ;;  %v654_v32 = vmul.f32 %v1326_v23, %v634_v26  ;;  %v658_v43 = vmul.f32 %v1327_v33, %v634_v26  ;;  %v643_v19 = vmul.f32 %v1648_v24, %v634_v26 }
 0x90b   :  { %v652_v34 = vmul.f32 %v651_v31, %v650_v30  ;;  %v664_v35 = vmul.f32 %v1648_v24, %v654_v32  ;;  %v655_v38 = vmul.f32 %v654_v32, %v651_v31  ;;  %v660_v39 = vmul.f32 %v1648_v24, %v650_v30 }
 0x90d   :  { %v665_v40 = vsel %vm71_vm0, %v664_v35, 0.0  ;;  %v656_v42 = vmul.f32 %v1326_v23, %v655_v38  ;;  %v661_v44 = vsel %vm71_vm0, %v660_v39, 0.0  ;;  %v686_v22 = vmul.f32 %v1648_v24, %v652_v34 }
 0x90e   :  { %666 = vadd.xlane.f32.xlu2 %v665_v40 }
 0x90f   :  { %v659_v37 = vadd.f32 %v658_v43, %v656_v42 }
 0x910   :  { %662 = vadd.xlane.f32.xlu0 %v661_v44 }
 0x911   :  { %v668_v45 = vmul.f32 %v1648_v24, %v659_v37 }
 0x913   :  { %v669_v17 = vsel %vm71_vm0, %v668_v45, 0.0 }
 0x916   :  { %670 = vadd.xlane.f32.xlu2 %v669_v17 }
 0x97b   :  { %v638_v20 = vpop.xlane.xlu0 %637 }
 0x97c   :  { %v639_v47 = vadd.f32 %v1668_v50, %v638_v20 }
 0x97e   :  { %1332 = vtanh.f32 %v639_v47 }
 0x981   :  { %v667_v48 = vpop.xlane.xlu2 %666 }
 0x983   :  { %v663_v55 = vpop.xlane.xlu0 %662 }
 0x984   :  { %v1863_v8 = vpop.eup %1332 }
 0x985   :  { %v641_v51 = vmul.f32 %v1863_v8, %v1863_v8  ;;  %v673_v53 = vmul.f32 -2.0, %v1863_v8 }
 0x987   :  { %v642_v52 = vsub.f32 1.0, %v641_v51 }
 0x989   :  { %v675_v28 = vmul.f32 %v667_v48, %v642_v52  ;;  %646 = vperm.xlu1 %1323, %v642_v52   ;;  %v671_v25 = vpop.xlane.xlu2 %670  ;;  %v672_v57 = vmul.f32 %v663_v55, %v642_v52 }
 0x98a   :  { %v678_v60 = vmul.f32 %v671_v25, %v642_v52 }
 0x98b   :  { %v676_v56 = vmul.f32 %v675_v28, %v673_v53  ;;  %v674_v36 = vmul.f32 %v673_v53, %v672_v57 }
 0x98d   :  { %v677_v58 = vmul.f32 %v676_v56, %v667_v48 }
 0x98f   :  { %v679_v15 = vadd.f32 %v678_v60, %v677_v58 }
 0x991   :  { %v752_v59 = vsel %vm287_vm1, %v679_v15, 0.0  ;;  %682 = vperm.xlu1 %1323, %v674_v36  }
 0x992   :  { %v753_v62 = vrot.slane %v752_v59, 4 }
 0x994   :  { %v754_v63 = vadd.f32 %v753_v62, %v752_v59 }
 0x996   :  { %v755_v1 = vrot.slane %v754_v63, 2 }
 0x998   :  { %v756_v12 = vadd.f32 %v755_v1, %v754_v63 }
 0x99a   :  { %v757_v14 = vrot.slane %v756_v12, 1 }
 0x99c   :  { %v758_v18 = vadd.f32 %v757_v14, %v756_v12 }
 0x99e   :  { %762 = vperm.xlu0 %1324, %v758_v18  }
 0x9fb   :  { %v647_v54 = vpop.permute.xlu1 %646 }
 0x9fc   :  { %v649_v21 = vmul.f32 %v647_v54, %v643_v19  ;;  %v687_v27 = vmul.f32 %v686_v22, %v647_v54 }
 0x9fe   :  { %1242 = vmatmul.msk.f32.vlgmr.msra.gmra.mxu3 %vm71_vm0, %v649_v21 }
 0xa03   :  { %v683_v23 = vpop.permute.xlu1 %682 }
 0xa04   :  { %v685_v29 = vmul.f32 %v683_v23, %v643_v19 }
 0xa06   :  { %v688_v30 = vadd.f32 %v687_v27, %v685_v29 }
 0xa08   :  { %1243 = vmatmul.msk.f32.gmra.mxu3 %vm71_vm0, %v688_v30 }
 0xa10   :  { %v763_v43 = vpop.permute.xlu0 %762 }
 0xa81   :  { %v712_v31 = vpop.f32.mrf.mxu3 }
 0xa82   :  { %v718_v32 = vmul.f32 %v712_v31, %v1838_v0  ;;  %v720_v26 = vmul.f32 %v712_v31, %v1842_v13 }
 0xa84   :  { %1244 = vmatmul.msk.f32.vlgmr.msrb.gmra.mxu0 %vm71_vm0, %v718_v32 }
 0xa8b   :  { %v715_v33 = vpop.f32.mrf.mxu3 }
 0xa8c   :  { %v719_v35 = vmul.f32 %v715_v33, %v1838_v0 }
 0xa8e   :  { %v721_v38 = vadd.f32 %v720_v26, %v719_v35 }
 0xa90   :  { %1245 = vmatmul.msk.f32.gmra.mxu0 %vm71_vm0, %v721_v38 }
 0xb01   :  { %v745_v34 = vpop.f32.mrf.mxu0 }
 0xb02   :  { %v1879_v39 = vadd.f32 %v745_v34, %v1781_v46 }
 0xb0d   :  { %v748_v40 = vpop.f32.mrf.mxu0 }
 0xb0e   :  { %v759_v42 = vmul.f32 %v748_v40, %v1688_v41 }
 0xb10   :  { %v765_v44 = vsub.f32 %v763_v43, %v759_v42 }
 0xb12   :  { %v766_v37 = vmul.f32 %v765_v44, %v765_v44 }
 0xb14   :  { %v767_v45 = vsel %vm71_vm0, %v766_v37, 0.0 }
 0xb15   :  { %768 = vadd.xlane.f32.xlu1 %v767_v45 }
 0xb88   :  { %v769_v17 = vpop.xlane.xlu1 %768 }
 0xb89   :  { %v770_v13 = vrot.slane %v769_v17, 4 }
 0xb8b   :  { %v771_v20 = vadd.f32 %v770_v13, %v769_v17 }
 0xb8d   :  { %v772_v0 = vrot.slane %v771_v20, 2 }
 0xb8f   :  { %v773_v47 = vadd.f32 %v772_v0, %v771_v20 }
 0xb91   :  { %v774_v48 = vrot.slane %v773_v47, 1 }
 0xb93   :  { %v775_v51 = vadd.f32 %v774_v48, %v773_v47 }
 0xb95   :  { %1284 = vpush %v775_v51 }
 0xbc4   :  { %782 = sbr.rel (%p1246_p2) target bundleno = 3019 (0xbcb), region = 61 }
 0xbc6   :  { %s1285_s23 = spop %1284 }
 0xbc7   :  { %v777_v46 = vstv %s1285_s23 }
 0xbc8   :  { %v1884_v52 = vadd.f32 %v777_v46, %v1787_v61 }
 0xbc9   :  { %783 = vst.msk [vmem:[#allocation8] sm:$0xff] %vm71_vm0, %v1879_v39 }
 0xbca   :  { %784 = vst.msk [vmem:[%s2065_s14] sm:$0xff] %vm287_vm1, %v1863_v8 }
 0xbcb PF:  { %787 = sbr.rel (%p1229_p1) target bundleno = 3025 (0xbd1), region = 65 }
 0xbd0   :  { %788 = vst.msk [vmem:[#allocation6] sm:$0xff] %vm71_vm0, %v745_v34 }
 0xbd1 PF:  { %1248 = vmatpush.xpose.msk.msra.mxu1 %vm71_vm0, %v1555_v2  ;;  %1253 = vmatpush.xpose.msk.msrb.mxu2 %vm71_vm0, %v1568_v4  ;;  %v1336_v58 = vld [vmem:[%s2060_s9 + $0x3] ss:$0 sm:$0xff]  ;;  %s2079_s19 = sld [smem:[#allocation16_spill]] }
 0xbd2   :  { %1334 = vset.pattern.permute.xlu1 %v1455_v49  ;;  %1335 = vset.pattern.permute.xlu0 %v1455_v49  ;;  %v1338_v54 = vld [vmem:[%s2062_s11 + $0x3] ss:$0 sm:$0xff] }
 0xbd3   :  { %960 = vmatpush.msrb.mxu3 %v1555_v2 }
 0xbd5   :  { %1249 = vmatpush.xpose.msk.msra.mxu1 %vm71_vm0, %v1563_v3  ;;  %1254 = vmatpush.xpose.msk.msrb.mxu2 %vm71_vm0, %v1575_v5 }
 0xbd6   :  { %961 = vmatpush.msrb.mxu3 %v1563_v3 }
 0xbd7   :  { %p1263_p3 = scmp.ne.s32.totalorder %s2079_s19, 3 }
 0xbd8   :  { %962 = vmatpush.msrb.mxu3 %v1584_v6 }
 0xbd9   :  { %1250 = vmatpush.xpose.msk.msra.mxu1 %vm71_vm0, %v1584_v6  ;;  %1255 = vmatpush.xpose.msk.msrb.mxu2 %vm71_vm0, %v1610_v9 }
 0xbda   :  { %963 = vmatpush.msrb.mxu3 %v1591_v7 }
 0xbdd   :  { %1251 = vmatpush.xpose.msk.msra.mxu1 %vm71_vm0, %v1591_v7  ;;  %1256 = vmatpush.xpose.msk.msrb.mxu2 %vm71_vm0, %v1618_v10 }
 0xbe0   :  { %1252 = vmatmul.msk.f32.vlgmr.msra.gmra.mxu1 %vm71_vm0, %v1879_v39 }
 0xbe1   :  { %927 = vmatpush.msrb.mxu1 %v1568_v4 }
 0xbe3   :  { %928 = vmatpush.msrb.mxu1 %v1575_v5 }
 0xbe5   :  { %929 = vmatpush.msrb.mxu1 %v1610_v9 }
 0xbe7   :  { %930 = vmatpush.msrb.mxu1 %v1618_v10 }
 0xc5d   :  { %v810_v61 = vpop.f32.mrf.mxu1 }
 0xc5e   :  { %v811_v8 = vadd.f32 %v1626_v11, %v810_v61 }
 0xc60   :  { %1339 = vtanh.f32 %v811_v8 }
 0xc66   :  { %v1340_v53 = vpop.eup %1339 }
 0xc67   :  { %1257 = vmatmul.msk.f32.vlgmr.msrb.gmra.mxu2 %vm71_vm0, %v1340_v53  ;;  %v814_v28 = vmul.f32 %v1340_v53, %v1340_v53  ;;  %v819_v56 = vmul.f32 -2.0, %v1340_v53 }
 0xc69   :  { %v1935_v55 = vsub.f32 1.0, %v814_v28 }
 0xc6b   :  { %v818_v25 = vmul.f32 %v1633_v16, %v1935_v55  ;;  %v1337_v16 = vld [vmem:[%s2061_s10 + $0x3] ss:$0 sm:$0xff] }
 0xc6d   :  { %v1939_v57 = vmul.f32 %v819_v56, %v818_v25 }
 0xc6f   :  { %1258 = vmatmul.msk.f32.gmra.mxu2 %vm71_vm0, %v818_v25 }
 0xcea   :  { %v844_v60 = vpop.f32.mrf.mxu2 }
 0xceb   :  { %v851_v36 = vadd.f32 %v1336_v58, %v844_v60 }
 0xced   :  { %1341 = vtanh.f32 %v851_v36 }
 0xcf2   :  { %v847_v12 = vpop.f32.mrf.mxu2 }
 0xcf3   :  { %v1342_v15 = vpop.eup %1341 }
 0xcf4   :  { %v853_v59 = vmul.f32 %v1342_v15, %v1342_v15  ;;  %v855_v62 = vmul.f32 %v1342_v15, %v1648_v24  ;;  %v871_v18 = vmul.f32 -2.0, %v1342_v15 }
 0xcf6   :  { %v854_v63 = vsub.f32 1.0, %v853_v59  ;;  %v856_v1 = vsel %vm71_vm0, %v855_v62, 0.0 }
 0xcf7   :  { %857 = vadd.xlane.f32.xlu0 %v856_v1 }
 0xcf8   :  { %v870_v14 = vmul.f32 %v854_v63, %v847_v12  ;;  %v874_v19 = vmul.f32 %v1337_v16, %v854_v63  ;;  %v878_v31 = vmul.f32 %v1338_v54, %v854_v63  ;;  %v863_v60 = vmul.f32 %v1648_v24, %v854_v63 }
 0xcfa   :  { %v872_v21 = vmul.f32 %v871_v18, %v870_v14  ;;  %v884_v22 = vmul.f32 %v1648_v24, %v874_v19  ;;  %v875_v23 = vmul.f32 %v874_v19, %v871_v18  ;;  %v880_v27 = vmul.f32 %v1648_v24, %v870_v14 }
 0xcfc   :  { %v885_v29 = vsel %vm71_vm0, %v884_v22, 0.0  ;;  %v876_v30 = vmul.f32 %v1337_v16, %v875_v23  ;;  %v881_v32 = vsel %vm71_vm0, %v880_v27, 0.0  ;;  %v906_v59 = vmul.f32 %v1648_v24, %v872_v21 }
 0xcfd   :  { %886 = vadd.xlane.f32.xlu2 %v885_v29 }
 0xcfe   :  { %v879_v33 = vadd.f32 %v878_v31, %v876_v30 }
 0xcff   :  { %882 = vadd.xlane.f32.xlu0 %v881_v32 }
 0xd00   :  { %v888_v26 = vmul.f32 %v1648_v24, %v879_v33 }
 0xd02   :  { %v889_v35 = vsel %vm71_vm0, %v888_v26, 0.0 }
 0xd05   :  { %890 = vadd.xlane.f32.xlu2 %v889_v35 }
 0xd6a   :  { %v858_v38 = vpop.xlane.xlu0 %857 }
 0xd6b   :  { %v859_v34 = vadd.f32 %v1668_v50, %v858_v38 }
 0xd6d   :  { %1343 = vtanh.f32 %v859_v34 }
 0xd70   :  { %v887_v40 = vpop.xlane.xlu2 %886 }
 0xd72   :  { %v883_v17 = vpop.xlane.xlu0 %882 }
 0xd73   :  { %v1960_v42 = vpop.eup %1343 }
 0xd74   :  { %v861_v43 = vmul.f32 %v1960_v42, %v1960_v42  ;;  %v893_v37 = vmul.f32 -2.0, %v1960_v42 }
 0xd76   :  { %v862_v44 = vsub.f32 1.0, %v861_v43 }
 0xd78   :  { %v895_v45 = vmul.f32 %v887_v40, %v862_v44  ;;  %866 = vperm.xlu1 %1334, %v862_v44   ;;  %v891_v13 = vpop.xlane.xlu2 %890  ;;  %v892_v0 = vmul.f32 %v883_v17, %v862_v44 }
 0xd79   :  { %v898_v48 = vmul.f32 %v891_v13, %v862_v44 }
 0xd7a   :  { %v896_v20 = vmul.f32 %v895_v45, %v893_v37  ;;  %v894_v51 = vmul.f32 %v893_v37, %v892_v0 }
 0xd7c   :  { %v897_v47 = vmul.f32 %v896_v20, %v887_v40 }
 0xd7e   :  { %v899_v46 = vadd.f32 %v898_v48, %v897_v47 }
 0xd80   :  { %v972_v61 = vsel %vm287_vm1, %v899_v46, 0.0  ;;  %902 = vperm.xlu1 %1334, %v894_v51  }
 0xd81   :  { %v973_v8 = vrot.slane %v972_v61, 4 }
 0xd83   :  { %v974_v53 = vadd.f32 %v973_v8, %v972_v61 }
 0xd85   :  { %v975_v28 = vrot.slane %v974_v53, 2 }
 0xd87   :  { %v976_v25 = vadd.f32 %v975_v28, %v974_v53 }
 0xd89   :  { %v977_v56 = vrot.slane %v976_v25, 1 }
 0xd8b   :  { %v978_v58 = vadd.f32 %v977_v56, %v976_v25 }
 0xd8d   :  { %982 = vperm.xlu0 %1335, %v978_v58  }
 0xdea   :  { %v867_v36 = vpop.permute.xlu1 %866 }
 0xdeb   :  { %v869_v15 = vmul.f32 %v867_v36, %v863_v60  ;;  %v907_v16 = vmul.f32 %v906_v59, %v867_v36 }
 0xded   :  { %1259 = vmatmul.msk.f32.vlgmr.msrb.gmra.mxu1 %vm71_vm0, %v869_v15 }
 0xdf2   :  { %v903_v62 = vpop.permute.xlu1 %902 }
 0xdf3   :  { %v905_v1 = vmul.f32 %v903_v62, %v863_v60 }
 0xdf5   :  { %v908_v12 = vadd.f32 %v907_v16, %v905_v1 }
 0xdf7   :  { %1260 = vmatmul.msk.f32.gmra.mxu1 %vm71_vm0, %v908_v12 }
 0xdff   :  { %v983_v30 = vpop.permute.xlu0 %982 }
 0xe6a   :  { %v932_v14 = vpop.f32.mrf.mxu1 }
 0xe6b   :  { %v938_v18 = vmul.f32 %v932_v14, %v1935_v55  ;;  %v940_v63 = vmul.f32 %v932_v14, %v1939_v57 }
 0xe6d   :  { %1261 = vmatmul.msk.f32.vlgmr.msrb.gmra.mxu3 %vm71_vm0, %v938_v18 }
 0xe74   :  { %v935_v19 = vpop.f32.mrf.mxu1 }
 0xe75   :  { %v939_v54 = vmul.f32 %v935_v19, %v1935_v55 }
 0xe77   :  { %v941_v22 = vadd.f32 %v940_v63, %v939_v54 }
 0xe79   :  { %1262 = vmatmul.msk.f32.gmra.mxu3 %vm71_vm0, %v941_v22 }
 0xef0   :  { %v965_v21 = vpop.f32.mrf.mxu3 }
 0xef1   :  { %v971_v23 = vadd.f32 %v965_v21, %v1879_v39 }
 0xefc   :  { %v968_v27 = vpop.f32.mrf.mxu3 }
 0xefd   :  { %v979_v29 = vmul.f32 %v968_v27, %v1688_v41 }
 0xeff   :  { %v985_v31 = vsub.f32 %v983_v30, %v979_v29 }
 0xf01   :  { %v986_v32 = vmul.f32 %v985_v31, %v985_v31 }
 0xf03   :  { %v987_v33 = vsel %vm71_vm0, %v986_v32, 0.0 }
 0xf04   :  { %988 = vadd.xlane.f32.xlu1 %v987_v33 }
 0xf77   :  { %v989_v26 = vpop.xlane.xlu1 %988 }
 0xf78   :  { %v990_v35 = vrot.slane %v989_v26, 4 }
 0xf7a   :  { %v991_v57 = vadd.f32 %v990_v35, %v989_v26 }
 0xf7c   :  { %v992_v38 = vrot.slane %v991_v57, 2 }
 0xf7e   :  { %v993_v55 = vadd.f32 %v992_v38, %v991_v57 }
 0xf80   :  { %v994_v34 = vrot.slane %v993_v55, 1 }
 0xf82   :  { %v995_v40 = vadd.f32 %v994_v34, %v993_v55 }
 0xf84   :  { %1286 = vpush %v995_v40 }
 0xfb3   :  { %1002 = sbr.rel (%p1263_p3) target bundleno = 4026 (0xfba), region = 69 }
 0xfb5   :  { %s1287_s10 = spop %1286 }
 0xfb6   :  { %v997_v43 = vstv %s1287_s10 }
 0xfb7   :  { %v998_v39 = vadd.f32 %v997_v43, %v1884_v52 }
 0xfb8   :  { %1003 = vst.msk [vmem:[#allocation8] sm:$0xff] %vm71_vm0, %v971_v23 }
 0xfb9   :  { %1004 = vst.msk [vmem:[%s2065_s14] sm:$0xff] %vm287_vm1, %v1960_v42 }
 0xfba PF:  { %1007 = sbr.rel (%p1246_p2) target bundleno = 4032 (0xfc0), region = 73 }
 0xfbf   :  { %1008 = vst.msk [vmem:[#allocation6] sm:$0xff] %vm71_vm0, %v965_v21 }
 0xfc0 PF:  { %1265 = vmatpush.xpose.msk.msra.mxu0 %vm71_vm0, %v1555_v2  ;;  %1270 = vmatpush.xpose.msk.msra.mxu1 %vm71_vm0, %v1568_v4 }
 0xfc1   :  { %1345 = vset.pattern.permute.xlu0 %v1455_v49  ;;  %1117 = vmatpush.msra.mxu2 %v1555_v2 }
 0xfc3   :  { %1118 = vmatpush.msra.mxu2 %v1563_v3 }
 0xfc4   :  { %1266 = vmatpush.xpose.msk.msra.mxu0 %vm71_vm0, %v1563_v3  ;;  %1271 = vmatpush.xpose.msk.msra.mxu1 %vm71_vm0, %v1575_v5 }
 0xfc5   :  { %1119 = vmatpush.msra.mxu2 %v1584_v6 }
 0xfc7   :  { %1120 = vmatpush.msra.mxu2 %v1591_v7 }
 0xfc8   :  { %1267 = vmatpush.xpose.msk.msra.mxu0 %vm71_vm0, %v1584_v6  ;;  %1272 = vmatpush.xpose.msk.msra.mxu1 %vm71_vm0, %v1610_v9 }
 0xfcc   :  { %1268 = vmatpush.xpose.msk.msra.mxu0 %vm71_vm0, %v1591_v7  ;;  %1273 = vmatpush.xpose.msk.msra.mxu1 %vm71_vm0, %v1618_v10  ;;  %v1346_v7 = vld [vmem:[%s2060_s9 + $0x4] ss:$0 sm:$0xff] }
 0xfcf   :  { %1269 = vmatmul.msk.f32.vlgmr.msra.gmra.mxu0 %vm71_vm0, %v971_v23 }
 0xfd0   :  { %1093 = vmatpush.msrb.mxu0 %v1568_v4 }
 0xfd2   :  { %1094 = vmatpush.msrb.mxu0 %v1575_v5 }
 0xfd4   :  { %1095 = vmatpush.msrb.mxu0 %v1610_v9 }
 0xfd6   :  { %1096 = vmatpush.msrb.mxu0 %v1618_v10 }
0x104c   :  { %v1030_v2 = vpop.f32.mrf.mxu0 }
0x104d   :  { %v1031_v3 = vadd.f32 %v1626_v11, %v1030_v2 }
0x104f   :  { %1347 = vtanh.f32 %v1031_v3 }
0x1055   :  { %v1348_v6 = vpop.eup %1347 }
0x1056   :  { %1274 = vmatmul.msk.f32.vlgmr.msra.gmra.mxu1 %vm71_vm0, %v1348_v6  ;;  %v1034_v0 = vmul.f32 %v1348_v6, %v1348_v6 }
0x1058   :  { %v1035_v47 = vsub.f32 1.0, %v1034_v0 }
0x10d3   :  { %v1057_v4 = vpop.f32.mrf.mxu1 }
0x10d4   :  { %v1058_v49 = vadd.f32 %v1346_v7, %v1057_v4 }
0x10d6   :  { %1349 = vtanh.f32 %v1058_v49 }
0x10dc   :  { %v1350_v41 = vpop.eup %1349 }
0x10dd   :  { %v1063_v5 = vmul.f32 %v1350_v41, %v1648_v24  ;;  %v1061_v37 = vmul.f32 %v1350_v41, %v1350_v41 }
0x10df   :  { %v1064_v9 = vsel %vm71_vm0, %v1063_v5, 0.0  ;;  %v1062_v45 = vsub.f32 1.0, %v1061_v37 }
0x10e0   :  { %1065 = vadd.xlane.f32.xlu0 %v1064_v9 }
0x10e1   :  { %v1071_v17 = vmul.f32 %v1648_v24, %v1062_v45 }
0x1153   :  { %v1066_v10 = vpop.xlane.xlu0 %1065 }
0x1154   :  { %v1067_v11 = vadd.f32 %v1668_v50, %v1066_v10 }
0x1156   :  { %1351 = vtanh.f32 %v1067_v11 }
0x115c   :  { %v1352_v52 = vpop.eup %1351 }
0x115d   :  { %v1069_v42 = vmul.f32 %v1352_v52, %v1352_v52 }
0x115f   :  { %v1070_v44 = vsub.f32 1.0, %v1069_v42 }
0x1161   :  { %1074 = vperm.xlu0 %1345, %v1070_v44  }
0x11d3   :  { %v1075_v13 = vpop.permute.xlu0 %1074 }
0x11d4   :  { %v1077_v20 = vmul.f32 %v1075_v13, %v1071_v17 }
0x11d6   :  { %1275 = vmatmul.msk.f32.vlgmr.msrb.gmra.mxu0 %vm71_vm0, %v1077_v20 }
0x1253   :  { %v1098_v48 = vpop.f32.mrf.mxu0 }
0x1254   :  { %v1101_v51 = vmul.f32 %v1098_v48, %v1035_v47 }
0x1256   :  { %1276 = vmatmul.msk.f32.vlgmr.msra.gmra.mxu2 %vm71_vm0, %v1101_v51 }
0x12d5   :  { %1127 = sbr.rel (%p1263_p3) target bundleno = 4827 (0x12db), region = 77 }
0x12d9   :  { %v1122_v50 = vpop.f32.mrf.mxu2 }
0x12da   :  { %1128 = vst.msk [vmem:[#allocation6] sm:$0xff] %vm71_vm0, %v1122_v50 }
0x12db PF:  { %v1129_v24 = vmul.f32 0.00390625, %v998_v39  ;;  %s1149_s27 = sshll.u32 %s2064_s13, 4  ;;  %s1457_s4 = smov [#allocation8]   ;;  %s1150_s27 = int_to_ptr.hbm [resolvable:$true] %s1149_s27 }
0x12dc   :  { %s1147_s8 = sshll.u32 %s1457_s4, 4  ;;  %s1458_s28 = smov [#allocation6]   ;;  %s1148_s8 = int_to_ptr.vmem [resolvable:$true] %s1147_s8 }
0x12dd   :  { %1130 = vst.msk [vmem:[#allocation11] sm:$0x1] %vm341_vm3, %v1129_v24  ;;  %1152 = dma.vmem_to_hbm [thread:$0]  %s1148_s8, 128, %s1150_s27, [#allocation9]  }
0x12de   :  { %s1136_s29 = sshll.u32 %s1458_s28, 4  ;;  %s1138_s0 = sshll.u32 %s2063_s12, 4  ;;  %s1137_s29 = int_to_ptr.vmem [resolvable:$true] %s1136_s29  ;;  %s1139_s0 = int_to_ptr.hbm [resolvable:$true] %s1138_s0 }
0x12df   :  { %1141 = dma.vmem_to_hbm [thread:$0]  %s1137_s29, 128, %s1139_s0, [#allocation7]  }
0x12e0   :  { %s1162_s13 = sshll.u32 %s2066_s15, 4  ;;  %s1459_s11 = smov [#allocation10]   ;;  %s1163_s13 = int_to_ptr.hbm [resolvable:$true] %s1162_s13 }
0x12e1   :  { %s1160_s18 = sshll.u32 %s1459_s11, 4  ;;  %s1460_s19 = smov [#allocation11]   ;;  %s1161_s18 = int_to_ptr.vmem [resolvable:$true] %s1160_s18 }
0x12e2   :  { %1165 = dma.vmem_to_hbm [thread:$0]  %s1161_s18, 16, %s1163_s13, [#allocation9]  }
0x12e3   :  { %s1171_s20 = sshll.u32 %s1460_s19, 4  ;;  %s1173_s22 = sshll.u32 %s2067_s16, 4  ;;  %s1172_s20 = int_to_ptr.vmem [resolvable:$true] %s1171_s20  ;;  %s1174_s22 = int_to_ptr.hbm [resolvable:$true] %s1173_s22 }
0x12e4   :  { %1176 = dma.vmem_to_hbm [thread:$0]  %s1172_s20, 16, %s1174_s22, [#allocation12]  }
0x12e5   :  { %1449 = dma.done.wait [#allocation7], 128  }
0x12e6   :  { %1450 = vsyncadd [#allocation7], 4294967168 }
0x12e7   :  { %1451 = dma.done.wait [#allocation9], 144  }
0x12e8   :  { %1452 = vsyncadd [#allocation9], 4294967152 }
0x12e9   :  { %1453 = dma.done.wait [#allocation12], 16  }
0x12ea   :  { %1454 = vsyncadd [#allocation12], 4294967280 }
0x12eb   :  { %1195 = vsyncpa [#allocation7], 1 }
0x12ec   :  { %1196 = vsyncpa [#allocation9], 1 }
0x12ed   :  { %1197 = vsyncpa [#allocation12], 1 }

</bundles_post_ra>
